<compile_context>
chip_gen: v6e
topology: v6e:2x2x1
jax: 0.10.0
libtpu: 0.0.40
codegen_flags: <defaults>
</compile_context>

<pallas_src>
import functools

import jax
import jax.numpy as jnp
from jax.experimental import pallas as pl
from jax.experimental.pallas import tpu as pltpu


# (block-tap b, within-block parity d) -> original 3x3 kernel index (missing => zero weight)
_TAP_TO_K = {(0, 1): 0, (1, 0): 1, (1, 1): 2}


def _round_up(x, m):
    return (x + m - 1) // m * m


# ----------------------------------------------------------------------------
# VMEM budgeting (generation aware)
# ----------------------------------------------------------------------------
def _vmem_budget_and_limit():
    default_cap = 64 * 1024 * 1024            # v7x per-TC capacity (the smallest)
    try:
        cap = int(getattr(pltpu.get_tpu_info(), "vmem_capacity_bytes", default_cap))
    except Exception:
        cap = default_cap
    # v7x (64 MiB): limit 48 MiB, tile budget ~28 MiB.  v5e/v6e (128 MiB): 96 / ~57 MiB.
    limit = min(3 * cap // 4, 96 * 1024 * 1024)
    budget = min(45 * cap // 100, limit - (8 << 20))
    return budget, limit


def _pick_tile_h(hout, ws, wout, c4, cout, budget, max_rows=None):
    """Largest divisor of hout whose (double-buffered) working set fits `budget`."""
    def tile_bytes(rows, cols, itemsize):
        return _round_up(max(rows, 1), 8) * _round_up(max(cols, 1), 128) * itemsize

    w_bytes = 4 * tile_bytes(c4, cout, 2) + tile_bytes(1, cout, 4)
    best = 1
    for t in range(1, hout + 1):
        if hout % t:
            continue
        if max_rows is not None and t > max_rows:
            break
        m = t * wout
        need = (2 * tile_bytes(t * ws, c4, 2)      # main input block (double-buffered)
                + 2 * tile_bytes(ws, c4, 2)        # halo row (double-buffered)
                + 2 * tile_bytes(m, cout, 2)       # output tile (double-buffered)
                + 2 * w_bytes                      # weights + bias
                + 2 * tile_bytes(m, c4, 2)         # live lhs temporaries
                + 2 * tile_bytes(m, cout, 4))      # f32 accumulator + pre-cast result
        if need <= budget:
            best = t
    return best


# ----------------------------------------------------------------------------
# Pallas kernel: 3x3/stride-2 conv (as 2x2 conv over space-to-depth input)
#                + bias + ReLU.  One (batch, row-tile) per grid step.
# ----------------------------------------------------------------------------
def _make_conv_kernel(tile_h, wout, c4, cout):
    m = tile_h * wout

    def kernel(xm_ref, xh_ref, w_ref, b_ref, out_ref):
        # xm_ref:  (1, tile_h, Ws, C4)   s2d rows [t*tile_h, (t+1)*tile_h)   bf16
        # xh_ref:  (1, 1, Ws, C4)        halo s2d row (t+1)*tile_h           bf16
        # w_ref:   (4, C4, Cout)         2x2-tap weight matrices             bf16
        # b_ref:   (1, Cout)             bias                                f32
        # out_ref: (1, tile_h, Wout, Cout)                                   bf16
        acc = jnp.zeros((m, cout), jnp.float32)
        for bw in range(2):                                   # static 2-tap column loop
            # bh = 0 tap: one whole-tile MXU matmul (M = tile_h * Wout).
            lhs0 = xm_ref[0, :, pl.ds(bw, wout), :].reshape(m, c4)
            acc += jnp.dot(lhs0, w_ref[bw], preferred_element_type=jnp.float32)
            # bh = 1 tap: rows shifted down by one s2d row.  Only the last output
            # row needs the halo, so reuse lhs0's rows and append the halo row.
            halo = xh_ref[0, 0, pl.ds(bw, wout), :]           # (Wout, C4)
            if tile_h > 1:
                lhs1 = jnp.concatenate([lhs0[wout:], halo], axis=0)
            else:
                lhs1 = halo
            acc += jnp.dot(lhs1, w_ref[2 + bw], preferred_element_type=jnp.float32)
        y = jnp.maximum(acc + b_ref[...], 0.0)
        out_ref[...] = y.reshape(1, tile_h, wout, cout).astype(out_ref.dtype)

    return kernel


def conv3x3s2_relu(x_nhwc, w_taps, bias, *, max_rows_per_tile=None):
    """3x3 stride-2 pad-1 conv + bias + ReLU via a Pallas kernel.

    x_nhwc: (N, H, W, Cin) bf16
    w_taps: (4, 4*Cin, Cout) bf16      bias: (1, Cout) f32
    returns (N, H//2, W//2, Cout) bf16
    """
    n, h, w, c = x_nhwc.shape
    assert h % 2 == 0 and w % 2 == 0
    hout, wout = h // 2, w // 2
    c4 = 4 * c
    cout = w_taps.shape[-1]
    assert w_taps.shape == (4, c4, cout) and bias.shape == (1, cout)

    # Space-to-depth (no data expansion) + one zero block-row/col at top/left:
    # the 3x3/s2/pad-1 conv becomes a dense 2x2/s1 conv -> 4 in-kernel MXU taps.
    # TODO(synk): emit this layout directly from the previous level's kernel.
    xs = x_nhwc.reshape(n, hout, 2, wout, 2, c)
    xs = xs.transpose(0, 1, 3, 2, 4, 5).reshape(n, hout, wout, c4)
    xs = jnp.pad(xs, ((0, 0), (1, 0), (1, 0), (0, 0)))        # (N, Hs, Ws, C4)
    hs, ws = hout + 1, wout + 1

    budget, vmem_limit = _vmem_budget_and_limit()
    tile_h = _pick_tile_h(hout, ws, wout, c4, cout, budget, max_rows_per_tile)
    n_tiles = hout // tile_h
    grid = (n, n_tiles)

    flops = 2 * n * hout * wout * (4 * c4) * cout
    bytes_accessed = (n * h * w * c * 2            # s2d glue read
                      + n * hs * ws * c4 * 2       # kernel read of s2d input
                      + 4 * c4 * cout * 2 + cout * 4
                      + n * hout * wout * cout * 2)

    kernel = _make_conv_kernel(tile_h, wout, c4, cout)
    return pl.pallas_call(
        kernel,
        out_shape=jax.ShapeDtypeStruct((n, hout, wout, cout), jnp.bfloat16),
        grid=grid,
        in_specs=[
            # main rows of the tile
            pl.BlockSpec((1, tile_h, ws, c4), lambda b, t: (b, t, 0, 0)),
            # +1 halo row just below the tile (block height 1 => element index)
            pl.BlockSpec((1, 1, ws, c4), lambda b, t: (b, (t + 1) * tile_h, 0, 0)),
            # weights & bias: constant index -> fetched once, VMEM-resident.
            # TODO(synk): pipeline_mode=pl.Buffered(1) for ResNet-sized weights.
            pl.BlockSpec((4, c4, cout), lambda b, t: (0, 0, 0)),
            pl.BlockSpec((1, cout), lambda b, t: (0, 0)),
        ],
        out_specs=pl.BlockSpec((1, tile_h, wout, cout), lambda b, t: (b, t, 0, 0)),
        compiler_params=pltpu.CompilerParams(
            dimension_semantics=("parallel", "parallel"),
            vmem_limit_bytes=vmem_limit),
        cost_estimate=pl.CostEstimate(
            flops=flops, transcendentals=0, bytes_accessed=bytes_accessed),
    )(xs, xs, w_taps, bias)


# ----------------------------------------------------------------------------
# Weight re-layout: PyTorch OIHW 3x3 weights -> 2x2 space-to-depth tap matrices
# ----------------------------------------------------------------------------
def _build_tap_weights(w_oihw):
    """(Cout, Cin, 3, 3) -> (4, 4*Cin, Cout); structurally-zero taps stay zero."""
    cout, cin = w_oihw.shape[0], w_oihw.shape[1]
    wt = jnp.zeros((2, 2, 2, 2, cin, cout), jnp.float32)      # (bh, bw, dh, dw, ci, co)
    for (bh, dh), kh in _TAP_TO_K.items():
        for (bw, dw), kw in _TAP_TO_K.items():
            wt = wt.at[bh, bw, dh, dw].set(w_oihw[:, :, kh, kw].T)
    return wt.reshape(4, 4 * cin, cout)


def init_backbone_params(input_channels, level_channels, seed=0):
    """Deterministic synthetic backbone weights.

    Returns (pallas_params, ref_params):
      pallas_params[l] = {"w_taps": (4, 4*Cin, Cout) bf16, "bias": (1, Cout) f32}
      ref_params[l]    = (w_oihw (Cout, Cin, 3, 3) f32, bias (Cout,) f32)
    """
    key = jax.random.PRNGKey(seed)
    params, ref_params = [], []
    cin = input_channels
    for lvl, cout in enumerate(level_channels):
        kw_, kb_ = jax.random.split(jax.random.fold_in(key, lvl))
        w = jax.random.normal(kw_, (cout, cin, 3, 3), jnp.float32)
        w = w * (1.0 / (3.0 * cin) ** 0.5)
        b = jax.random.normal(kb_, (cout,), jnp.float32) * 0.01
        params.append({"w_taps": _build_tap_weights(w).astype(jnp.bfloat16),
                       "bias": b[None, :].astype(jnp.float32)})
        ref_params.append((w, b))
        cin = cout
    return params, ref_params


# ----------------------------------------------------------------------------
# functional.interpolate(mode='nearest') fallback (identity at these strides)
# ----------------------------------------------------------------------------
def _nearest_resize_nchw(x, out_h, out_w):
    _, _, h, w = x.shape
    rows = (jnp.arange(out_h) * h // out_h).astype(jnp.int32)
    cols = (jnp.arange(out_w) * w // out_w).astype(jnp.int32)
    return x[:, :, rows][:, :, :, cols]


# ----------------------------------------------------------------------------
# Forward
# ----------------------------------------------------------------------------
@functools.partial(jax.jit, static_argnums=(2, 3))
def torchvision_backbone_forward(x_nchw, params, level_channels, max_rows_per_tile=None):
    n, c, h, w = x_nchw.shape
    top_level = len(level_channels)
    assert h % (2 ** top_level) == 0 and w % (2 ** top_level) == 0

    # self.normalize is nn.Identity() (pretrained=False); bf16 MXU operands.
    cur = jnp.transpose(x_nchw, (0, 2, 3, 1)).astype(jnp.bfloat16)

    feats = []
    # TODO(synk): fuse the micro-sized deep levels into one pallas_call.
    for lvl in range(top_level):
        cur = conv3x3s2_relu(cur, params[lvl]["w_taps"], params[lvl]["bias"],
                             max_rows_per_tile=max_rows_per_tile)
        feats.append(cur)          # stays NHWC, true channel widths

    # Boundary glue back to the module's NCHW float32 contract.
    outputs = [x_nchw]
    for lvl, f in enumerate(feats, start=1):
        f_nchw = jnp.transpose(f, (0, 3, 1, 2)).astype(x_nchw.dtype)
        oh, ow = h // 2 ** lvl, w // 2 ** lvl
        if f_nchw.shape[2:] != (oh, ow):   # functional.interpolate(nearest): identity here
            f_nchw = _nearest_resize_nchw(f_nchw, oh, ow)
        outputs.append(f_nchw)
    return outputs


# ----------------------------------------------------------------------------
# Pure-JAX reference with matching numerics (bf16 operands, f32 accumulation)
# ----------------------------------------------------------------------------
def _reference_forward(x_nchw, ref_params, level_channels):
    cur = jnp.transpose(x_nchw, (0, 2, 3, 1)).astype(jnp.bfloat16)
    outputs = [x_nchw]
    for w_oihw, b in ref_params:
        y = jax.lax.conv_general_dilated(
            cur, jnp.transpose(w_oihw, (2, 3, 1, 0)).astype(jnp.bfloat16),
            window_strides=(2, 2), padding=((1, 1), (1, 1)),
            dimension_numbers=("NHWC", "HWIO", "NHWC"),
            preferred_element_type=jnp.float32)
        y = jnp.maximum(y + b[None, None, None, :], 0.0)
        cur = y.astype(jnp.bfloat16)
        outputs.append(jnp.transpose(cur, (0, 3, 1, 2)).astype(jnp.float32))
    return outputs


if __name__ == "__main__":
    TOP_LEVEL = 5
    INPUT_CHANNELS = 4
    LEVEL_CHANNELS = (8, 16, 32, 32, 32)   # synthetic backbone widths, levels 1..5
    N, H, W = 2, 32, 32                    # H, W must be divisible by 2**top_level = 32

    assert H % (2 ** TOP_LEVEL) == 0 and W % (2 ** TOP_LEVEL) == 0

    key = jax.random.PRNGKey(0)
    x = jax.random.normal(key, (N, INPUT_CHANNELS, H, W), jnp.float32)  # NCHW like PyTorch

    params, ref_params = init_backbone_params(INPUT_CHANNELS, LEVEL_CHANNELS, seed=0)
    out_channels = [INPUT_CHANNELS] + list(LEVEL_CHANNELS)  # mirrors self.out_channels

    # max_rows_per_tile=8 exercises the multi-row-tile (halo) path at these sizes.
    outputs = torchvision_backbone_forward(x, params, LEVEL_CHANNELS, 8)
    outputs = [jax.block_until_ready(o) for o in outputs]

    # shape/dtype contract: [input] + stride-2**l features resized to H/2**l
    expected = [(N, c, H // 2 ** l, W // 2 ** l) for l, c in enumerate(out_channels)]
    assert [tuple(o.shape) for o in outputs] == expected, (
        [tuple(o.shape) for o in outputs], expected)
    assert all(o.dtype == jnp.float32 for o in outputs)

    # numerical check against a pure-JAX conv reference (same bf16/f32 numerics)
    refs = _reference_forward(x, ref_params, LEVEL_CHANNELS)
    for lvl, (o, r) in enumerate(zip(outputs, refs)):
        assert jnp.allclose(o, r, rtol=2e-2, atol=2e-2), (
            "level", lvl, float(jnp.max(jnp.abs(o - r))))

    print("KERNEL_OK")
</pallas_src>

<mosaic_0001>
module attributes {stable_mosaic.version = 11 : i64} {
  func.func @kernel(%arg0: i32, %arg1: i32, %arg2: memref<1x8x17x16xbf16, #tpu.memory_space<vmem>>, %arg3: memref<1x1x17x16xbf16, #tpu.memory_space<vmem>>, %arg4: memref<4x16x8xbf16, #tpu.memory_space<vmem>>, %arg5: memref<1x8xf32, #tpu.memory_space<vmem>>, %arg6: memref<1x8x16x8xbf16, #tpu.memory_space<vmem>>) attributes {dimension_semantics = [#tpu.dimension_semantics<parallel>, #tpu.dimension_semantics<parallel>], iteration_bounds = array<i64: 2, 2>, scalar_prefetch = 0 : i64, scratch_operands = 0 : i64, tpu.core_type = #tpu.core_type<tc>, window_params = [{transform_indices = @transform_0, window_bounds = array<i64: 1, 8, 17, 16>}, {transform_indices = @transform_1, window_bounds = array<i64: 1, 1, 17, 16>}, {pipeline_mode = #tpu.pipeline_mode<synchronous>, transform_indices = @transform_2, window_bounds = array<i64: 4, 16, 8>}, {pipeline_mode = #tpu.pipeline_mode<synchronous>, transform_indices = @transform_3, window_bounds = array<i64: 1, 8>}, {transform_indices = @transform_4, window_bounds = array<i64: 1, 8, 16, 8>}]} {
    %cst = arith.constant 0.000000e+00 : f32
    %0 = vector.broadcast %cst : f32 to vector<128x8xf32>
    %c0 = arith.constant 0 : index
    %c0_0 = arith.constant 0 : index
    %c0_1 = arith.constant 0 : index
    %c0_2 = arith.constant 0 : index
    %1 = vector.load %arg2[%c0, %c0_0, %c0_1, %c0_2] : memref<1x8x17x16xbf16, #tpu.memory_space<vmem>>, vector<1x8x16x16xbf16>
    %2 = vector.shape_cast %1 : vector<1x8x16x16xbf16> to vector<8x16x16xbf16>
    %3 = vector.shape_cast %2 : vector<8x16x16xbf16> to vector<128x16xbf16>
    %c0_3 = arith.constant 0 : index
    %c0_4 = arith.constant 0 : index
    %c0_5 = arith.constant 0 : index
    %4 = vector.load %arg4[%c0_3, %c0_4, %c0_5] : memref<4x16x8xbf16, #tpu.memory_space<vmem>>, vector<1x16x8xbf16>
    %5 = vector.shape_cast %4 : vector<1x16x8xbf16> to vector<16x8xbf16>
    %cst_6 = arith.constant dense<0.000000e+00> : vector<128x8xf32>
    %6 = tpu.matmul %3, %5, %cst_6 {dimension_numbers = #tpu.dot_dimension_numbers<[1], [0], [0], [1], [0, 0, 1, 1], [], []>} : vector<128x16xbf16>, vector<16x8xbf16>, vector<128x8xf32> -> vector<128x8xf32>
    %7 = arith.addf %0, %6 : vector<128x8xf32>
    %c0_7 = arith.constant 0 : index
    %c0_8 = arith.constant 0 : index
    %c0_9 = arith.constant 0 : index
    %c0_10 = arith.constant 0 : index
    %8 = vector.load %arg3[%c0_7, %c0_8, %c0_9, %c0_10] : memref<1x1x17x16xbf16, #tpu.memory_space<vmem>>, vector<1x1x16x16xbf16>
    %9 = vector.shape_cast %8 : vector<1x1x16x16xbf16> to vector<16x16xbf16>
    %10 = vector.extract_strided_slice %3 {offsets = [16, 0], sizes = [112, 16], strides = [1, 1]} : vector<128x16xbf16> to vector<112x16xbf16>
    %11 = tpu.concatenate %10, %9 in 0 : vector<112x16xbf16>, vector<16x16xbf16> -> vector<128x16xbf16>
    %c2 = arith.constant 2 : index
    %c0_11 = arith.constant 0 : index
    %c0_12 = arith.constant 0 : index
    %12 = vector.load %arg4[%c2, %c0_11, %c0_12] : memref<4x16x8xbf16, #tpu.memory_space<vmem>>, vector<1x16x8xbf16>
    %13 = vector.shape_cast %12 : vector<1x16x8xbf16> to vector<16x8xbf16>
    %cst_13 = arith.constant dense<0.000000e+00> : vector<128x8xf32>
    %14 = tpu.matmul %11, %13, %cst_13 {dimension_numbers = #tpu.dot_dimension_numbers<[1], [0], [0], [1], [0, 0, 1, 1], [], []>} : vector<128x16xbf16>, vector<16x8xbf16>, vector<128x8xf32> -> vector<128x8xf32>
    %15 = arith.addf %7, %14 : vector<128x8xf32>
    %c0_14 = arith.constant 0 : index
    %c0_15 = arith.constant 0 : index
    %c1 = arith.constant 1 : index
    %c0_16 = arith.constant 0 : index
    %16 = vector.load %arg2[%c0_14, %c0_15, %c1, %c0_16] : memref<1x8x17x16xbf16, #tpu.memory_space<vmem>>, vector<1x8x16x16xbf16>
    %17 = vector.shape_cast %16 : vector<1x8x16x16xbf16> to vector<8x16x16xbf16>
    %18 = vector.shape_cast %17 : vector<8x16x16xbf16> to vector<128x16xbf16>
    %c1_17 = arith.constant 1 : index
    %c0_18 = arith.constant 0 : index
    %c0_19 = arith.constant 0 : index
    %19 = vector.load %arg4[%c1_17, %c0_18, %c0_19] : memref<4x16x8xbf16, #tpu.memory_space<vmem>>, vector<1x16x8xbf16>
    %20 = vector.shape_cast %19 : vector<1x16x8xbf16> to vector<16x8xbf16>
    %cst_20 = arith.constant dense<0.000000e+00> : vector<128x8xf32>
    %21 = tpu.matmul %18, %20, %cst_20 {dimension_numbers = #tpu.dot_dimension_numbers<[1], [0], [0], [1], [0, 0, 1, 1], [], []>} : vector<128x16xbf16>, vector<16x8xbf16>, vector<128x8xf32> -> vector<128x8xf32>
    %22 = arith.addf %15, %21 : vector<128x8xf32>
    %c0_21 = arith.constant 0 : index
    %c0_22 = arith.constant 0 : index
    %c1_23 = arith.constant 1 : index
    %c0_24 = arith.constant 0 : index
    %23 = vector.load %arg3[%c0_21, %c0_22, %c1_23, %c0_24] : memref<1x1x17x16xbf16, #tpu.memory_space<vmem>>, vector<1x1x16x16xbf16>
    %24 = vector.shape_cast %23 : vector<1x1x16x16xbf16> to vector<16x16xbf16>
    %25 = vector.extract_strided_slice %18 {offsets = [16, 0], sizes = [112, 16], strides = [1, 1]} : vector<128x16xbf16> to vector<112x16xbf16>
    %26 = tpu.concatenate %25, %24 in 0 : vector<112x16xbf16>, vector<16x16xbf16> -> vector<128x16xbf16>
    %c3 = arith.constant 3 : index
    %c0_25 = arith.constant 0 : index
    %c0_26 = arith.constant 0 : index
    %27 = vector.load %arg4[%c3, %c0_25, %c0_26] : memref<4x16x8xbf16, #tpu.memory_space<vmem>>, vector<1x16x8xbf16>
    %28 = vector.shape_cast %27 : vector<1x16x8xbf16> to vector<16x8xbf16>
    %cst_27 = arith.constant dense<0.000000e+00> : vector<128x8xf32>
    %29 = tpu.matmul %26, %28, %cst_27 {dimension_numbers = #tpu.dot_dimension_numbers<[1], [0], [0], [1], [0, 0, 1, 1], [], []>} : vector<128x16xbf16>, vector<16x8xbf16>, vector<128x8xf32> -> vector<128x8xf32>
    %30 = arith.addf %22, %29 : vector<128x8xf32>
    %c0_28 = arith.constant 0 : index
    %c0_29 = arith.constant 0 : index
    %31 = vector.load %arg5[%c0_28, %c0_29] : memref<1x8xf32, #tpu.memory_space<vmem>>, vector<1x8xf32>
    %32 = vector.broadcast %31 : vector<1x8xf32> to vector<128x8xf32>
    %33 = arith.addf %30, %32 : vector<128x8xf32>
    %cst_30 = arith.constant 0.000000e+00 : f32
    %34 = vector.broadcast %cst_30 : f32 to vector<128x8xf32>
    %35 = arith.maximumf %33, %34 : vector<128x8xf32>
    %36 = vector.shape_cast %35 : vector<128x8xf32> to vector<1x8x16x8xf32>
    %37 = arith.truncf %36 : vector<1x8x16x8xf32> to vector<1x8x16x8xbf16>
    %c0_31 = arith.constant 0 : index
    %c0_32 = arith.constant 0 : index
    %c0_33 = arith.constant 0 : index
    %c0_34 = arith.constant 0 : index
    %38 = vector.load %arg6[%c0_31, %c0_32, %c0_33, %c0_34] : memref<1x8x16x8xbf16, #tpu.memory_space<vmem>>, vector<1x8x16x8xbf16>
    tpu.vector_store %arg6[%c0_31, %c0_32, %c0_33, %c0_34], %37 {strides = array<i32>} : memref<1x8x16x8xbf16, #tpu.memory_space<vmem>>, vector<1x8x16x8xbf16>,
    return
  }
  func.func @transform_0(%arg0: i32, %arg1: i32) -> (i32, i32, i32, i32) {
    %c0_i32 = arith.constant 0 : i32
    %c0_i32_0 = arith.constant 0 : i32
    %c0_i32_1 = arith.constant 0 : i32
    return %arg0, %arg1, %c0_i32, %c0_i32_0 : i32, i32, i32, i32
  }
  func.func @transform_1(%arg0: i32, %arg1: i32) -> (i32, i32, i32, i32) {
    %c1_i32 = arith.constant 1 : i32
    %0 = arith.addi %arg1, %c1_i32 : i32
    %c8_i32 = arith.constant 8 : i32
    %1 = arith.muli %0, %c8_i32 : i32
    %c0_i32 = arith.constant 0 : i32
    %c0_i32_0 = arith.constant 0 : i32
    %c0_i32_1 = arith.constant 0 : i32
    return %arg0, %1, %c0_i32, %c0_i32_0 : i32, i32, i32, i32
  }
  func.func @transform_2(%arg0: i32, %arg1: i32) -> (i32, i32, i32) {
    %c0_i32 = arith.constant 0 : i32
    %c0_i32_0 = arith.constant 0 : i32
    %c0_i32_1 = arith.constant 0 : i32
    %c0_i32_2 = arith.constant 0 : i32
    return %c0_i32, %c0_i32_0, %c0_i32_1 : i32, i32, i32
  }
  func.func @transform_3(%arg0: i32, %arg1: i32) -> (i32, i32) {
    %c0_i32 = arith.constant 0 : i32
    %c0_i32_0 = arith.constant 0 : i32
    %c0_i32_1 = arith.constant 0 : i32
    return %c0_i32, %c0_i32_0 : i32, i32
  }
  func.func @transform_4(%arg0: i32, %arg1: i32) -> (i32, i32, i32, i32) {
    %c0_i32 = arith.constant 0 : i32
    %c0_i32_0 = arith.constant 0 : i32
    %c0_i32_1 = arith.constant 0 : i32
    return %arg0, %arg1, %c0_i32, %c0_i32_0 : i32, i32, i32, i32
  }
}

module attributes {stable_mosaic.version = 11 : i64} {
  func.func @kernel(%arg0: i32, %arg1: i32, %arg2: memref<1x8x9x32xbf16, #tpu.memory_space<vmem>>, %arg3: memref<1x1x9x32xbf16, #tpu.memory_space<vmem>>, %arg4: memref<4x32x16xbf16, #tpu.memory_space<vmem>>, %arg5: memref<1x16xf32, #tpu.memory_space<vmem>>, %arg6: memref<1x8x8x16xbf16, #tpu.memory_space<vmem>>) attributes {dimension_semantics = [#tpu.dimension_semantics<parallel>, #tpu.dimension_semantics<parallel>], iteration_bounds = array<i64: 2, 1>, scalar_prefetch = 0 : i64, scratch_operands = 0 : i64, tpu.core_type = #tpu.core_type<tc>, window_params = [{transform_indices = @transform_0, window_bounds = array<i64: 1, 8, 9, 32>}, {transform_indices = @transform_1, window_bounds = array<i64: 1, 1, 9, 32>}, {pipeline_mode = #tpu.pipeline_mode<synchronous>, transform_indices = @transform_2, window_bounds = array<i64: 4, 32, 16>}, {pipeline_mode = #tpu.pipeline_mode<synchronous>, transform_indices = @transform_3, window_bounds = array<i64: 1, 16>}, {transform_indices = @transform_4, window_bounds = array<i64: 1, 8, 8, 16>}]} {
    %cst = arith.constant 0.000000e+00 : f32
    %0 = vector.broadcast %cst : f32 to vector<64x16xf32>
    %c0 = arith.constant 0 : index
    %c0_0 = arith.constant 0 : index
    %c0_1 = arith.constant 0 : index
    %c0_2 = arith.constant 0 : index
    %1 = vector.load %arg2[%c0, %c0_0, %c0_1, %c0_2] : memref<1x8x9x32xbf16, #tpu.memory_space<vmem>>, vector<1x8x8x32xbf16>
    %2 = vector.shape_cast %1 : vector<1x8x8x32xbf16> to vector<8x8x32xbf16>
    %3 = vector.shape_cast %2 : vector<8x8x32xbf16> to vector<64x32xbf16>
    %c0_3 = arith.constant 0 : index
    %c0_4 = arith.constant 0 : index
    %c0_5 = arith.constant 0 : index
    %4 = vector.load %arg4[%c0_3, %c0_4, %c0_5] : memref<4x32x16xbf16, #tpu.memory_space<vmem>>, vector<1x32x16xbf16>
    %5 = vector.shape_cast %4 : vector<1x32x16xbf16> to vector<32x16xbf16>
    %cst_6 = arith.constant dense<0.000000e+00> : vector<64x16xf32>
    %6 = tpu.matmul %3, %5, %cst_6 {dimension_numbers = #tpu.dot_dimension_numbers<[1], [0], [0], [1], [0, 0, 1, 1], [], []>} : vector<64x32xbf16>, vector<32x16xbf16>, vector<64x16xf32> -> vector<64x16xf32>
    %7 = arith.addf %0, %6 : vector<64x16xf32>
    %c0_7 = arith.constant 0 : index
    %c0_8 = arith.constant 0 : index
    %c0_9 = arith.constant 0 : index
    %c0_10 = arith.constant 0 : index
    %8 = vector.load %arg3[%c0_7, %c0_8, %c0_9, %c0_10] : memref<1x1x9x32xbf16, #tpu.memory_space<vmem>>, vector<1x1x8x32xbf16>
    %9 = vector.shape_cast %8 : vector<1x1x8x32xbf16> to vector<8x32xbf16>
    %10 = vector.extract_strided_slice %3 {offsets = [8, 0], sizes = [56, 32], strides = [1, 1]} : vector<64x32xbf16> to vector<56x32xbf16>
    %11 = tpu.concatenate %10, %9 in 0 : vector<56x32xbf16>, vector<8x32xbf16> -> vector<64x32xbf16>
    %c2 = arith.constant 2 : index
    %c0_11 = arith.constant 0 : index
    %c0_12 = arith.constant 0 : index
    %12 = vector.load %arg4[%c2, %c0_11, %c0_12] : memref<4x32x16xbf16, #tpu.memory_space<vmem>>, vector<1x32x16xbf16>
    %13 = vector.shape_cast %12 : vector<1x32x16xbf16> to vector<32x16xbf16>
    %cst_13 = arith.constant dense<0.000000e+00> : vector<64x16xf32>
    %14 = tpu.matmul %11, %13, %cst_13 {dimension_numbers = #tpu.dot_dimension_numbers<[1], [0], [0], [1], [0, 0, 1, 1], [], []>} : vector<64x32xbf16>, vector<32x16xbf16>, vector<64x16xf32> -> vector<64x16xf32>
    %15 = arith.addf %7, %14 : vector<64x16xf32>
    %c0_14 = arith.constant 0 : index
    %c0_15 = arith.constant 0 : index
    %c1 = arith.constant 1 : index
    %c0_16 = arith.constant 0 : index
    %16 = vector.load %arg2[%c0_14, %c0_15, %c1, %c0_16] : memref<1x8x9x32xbf16, #tpu.memory_space<vmem>>, vector<1x8x8x32xbf16>
    %17 = vector.shape_cast %16 : vector<1x8x8x32xbf16> to vector<8x8x32xbf16>
    %18 = vector.shape_cast %17 : vector<8x8x32xbf16> to vector<64x32xbf16>
    %c1_17 = arith.constant 1 : index
    %c0_18 = arith.constant 0 : index
    %c0_19 = arith.constant 0 : index
    %19 = vector.load %arg4[%c1_17, %c0_18, %c0_19] : memref<4x32x16xbf16, #tpu.memory_space<vmem>>, vector<1x32x16xbf16>
    %20 = vector.shape_cast %19 : vector<1x32x16xbf16> to vector<32x16xbf16>
    %cst_20 = arith.constant dense<0.000000e+00> : vector<64x16xf32>
    %21 = tpu.matmul %18, %20, %cst_20 {dimension_numbers = #tpu.dot_dimension_numbers<[1], [0], [0], [1], [0, 0, 1, 1], [], []>} : vector<64x32xbf16>, vector<32x16xbf16>, vector<64x16xf32> -> vector<64x16xf32>
    %22 = arith.addf %15, %21 : vector<64x16xf32>
    %c0_21 = arith.constant 0 : index
    %c0_22 = arith.constant 0 : index
    %c1_23 = arith.constant 1 : index
    %c0_24 = arith.constant 0 : index
    %23 = vector.load %arg3[%c0_21, %c0_22, %c1_23, %c0_24] : memref<1x1x9x32xbf16, #tpu.memory_space<vmem>>, vector<1x1x8x32xbf16>
    %24 = vector.shape_cast %23 : vector<1x1x8x32xbf16> to vector<8x32xbf16>
    %25 = vector.extract_strided_slice %18 {offsets = [8, 0], sizes = [56, 32], strides = [1, 1]} : vector<64x32xbf16> to vector<56x32xbf16>
    %26 = tpu.concatenate %25, %24 in 0 : vector<56x32xbf16>, vector<8x32xbf16> -> vector<64x32xbf16>
    %c3 = arith.constant 3 : index
    %c0_25 = arith.constant 0 : index
    %c0_26 = arith.constant 0 : index
    %27 = vector.load %arg4[%c3, %c0_25, %c0_26] : memref<4x32x16xbf16, #tpu.memory_space<vmem>>, vector<1x32x16xbf16>
    %28 = vector.shape_cast %27 : vector<1x32x16xbf16> to vector<32x16xbf16>
    %cst_27 = arith.constant dense<0.000000e+00> : vector<64x16xf32>
    %29 = tpu.matmul %26, %28, %cst_27 {dimension_numbers = #tpu.dot_dimension_numbers<[1], [0], [0], [1], [0, 0, 1, 1], [], []>} : vector<64x32xbf16>, vector<32x16xbf16>, vector<64x16xf32> -> vector<64x16xf32>
    %30 = arith.addf %22, %29 : vector<64x16xf32>
    %c0_28 = arith.constant 0 : index
    %c0_29 = arith.constant 0 : index
    %31 = vector.load %arg5[%c0_28, %c0_29] : memref<1x16xf32, #tpu.memory_space<vmem>>, vector<1x16xf32>
    %32 = vector.broadcast %31 : vector<1x16xf32> to vector<64x16xf32>
    %33 = arith.addf %30, %32 : vector<64x16xf32>
    %cst_30 = arith.constant 0.000000e+00 : f32
    %34 = vector.broadcast %cst_30 : f32 to vector<64x16xf32>
    %35 = arith.maximumf %33, %34 : vector<64x16xf32>
    %36 = vector.shape_cast %35 : vector<64x16xf32> to vector<1x8x8x16xf32>
    %37 = arith.truncf %36 : vector<1x8x8x16xf32> to vector<1x8x8x16xbf16>
    %c0_31 = arith.constant 0 : index
    %c0_32 = arith.constant 0 : index
    %c0_33 = arith.constant 0 : index
    %c0_34 = arith.constant 0 : index
    %38 = vector.load %arg6[%c0_31, %c0_32, %c0_33, %c0_34] : memref<1x8x8x16xbf16, #tpu.memory_space<vmem>>, vector<1x8x8x16xbf16>
    tpu.vector_store %arg6[%c0_31, %c0_32, %c0_33, %c0_34], %37 {strides = array<i32>} : memref<1x8x8x16xbf16, #tpu.memory_space<vmem>>, vector<1x8x8x16xbf16>,
    return
  }
  func.func @transform_0(%arg0: i32, %arg1: i32) -> (i32, i32, i32, i32) {
    %c0_i32 = arith.constant 0 : i32
    %c0_i32_0 = arith.constant 0 : i32
    %c0_i32_1 = arith.constant 0 : i32
    return %arg0, %arg1, %c0_i32, %c0_i32_0 : i32, i32, i32, i32
  }
  func.func @transform_1(%arg0: i32, %arg1: i32) -> (i32, i32, i32, i32) {
    %c1_i32 = arith.constant 1 : i32
    %0 = arith.addi %arg1, %c1_i32 : i32
    %c8_i32 = arith.constant 8 : i32
    %1 = arith.muli %0, %c8_i32 : i32
    %c0_i32 = arith.constant 0 : i32
    %c0_i32_0 = arith.constant 0 : i32
    %c0_i32_1 = arith.constant 0 : i32
    return %arg0, %1, %c0_i32, %c0_i32_0 : i32, i32, i32, i32
  }
  func.func @transform_2(%arg0: i32, %arg1: i32) -> (i32, i32, i32) {
    %c0_i32 = arith.constant 0 : i32
    %c0_i32_0 = arith.constant 0 : i32
    %c0_i32_1 = arith.constant 0 : i32
    %c0_i32_2 = arith.constant 0 : i32
    return %c0_i32, %c0_i32_0, %c0_i32_1 : i32, i32, i32
  }
  func.func @transform_3(%arg0: i32, %arg1: i32) -> (i32, i32) {
    %c0_i32 = arith.constant 0 : i32
    %c0_i32_0 = arith.constant 0 : i32
    %c0_i32_1 = arith.constant 0 : i32
    return %c0_i32, %c0_i32_0 : i32, i32
  }
  func.func @transform_4(%arg0: i32, %arg1: i32) -> (i32, i32, i32, i32) {
    %c0_i32 = arith.constant 0 : i32
    %c0_i32_0 = arith.constant 0 : i32
    %c0_i32_1 = arith.constant 0 : i32
    return %arg0, %arg1, %c0_i32, %c0_i32_0 : i32, i32, i32, i32
  }
}

module attributes {stable_mosaic.version = 11 : i64} {
  func.func @kernel(%arg0: i32, %arg1: i32, %arg2: memref<1x4x5x64xbf16, #tpu.memory_space<vmem>>, %arg3: memref<1x1x5x64xbf16, #tpu.memory_space<vmem>>, %arg4: memref<4x64x32xbf16, #tpu.memory_space<vmem>>, %arg5: memref<1x32xf32, #tpu.memory_space<vmem>>, %arg6: memref<1x4x4x32xbf16, #tpu.memory_space<vmem>>) attributes {dimension_semantics = [#tpu.dimension_semantics<parallel>, #tpu.dimension_semantics<parallel>], iteration_bounds = array<i64: 2, 1>, scalar_prefetch = 0 : i64, scratch_operands = 0 : i64, tpu.core_type = #tpu.core_type<tc>, window_params = [{transform_indices = @transform_0, window_bounds = array<i64: 1, 4, 5, 64>}, {transform_indices = @transform_1, window_bounds = array<i64: 1, 1, 5, 64>}, {pipeline_mode = #tpu.pipeline_mode<synchronous>, transform_indices = @transform_2, window_bounds = array<i64: 4, 64, 32>}, {pipeline_mode = #tpu.pipeline_mode<synchronous>, transform_indices = @transform_3, window_bounds = array<i64: 1, 32>}, {transform_indices = @transform_4, window_bounds = array<i64: 1, 4, 4, 32>}]} {
    %cst = arith.constant 0.000000e+00 : f32
    %0 = vector.broadcast %cst : f32 to vector<16x32xf32>
    %c0 = arith.constant 0 : index
    %c0_0 = arith.constant 0 : index
    %c0_1 = arith.constant 0 : index
    %c0_2 = arith.constant 0 : index
    %1 = vector.load %arg2[%c0, %c0_0, %c0_1, %c0_2] : memref<1x4x5x64xbf16, #tpu.memory_space<vmem>>, vector<1x4x4x64xbf16>
    %2 = vector.shape_cast %1 : vector<1x4x4x64xbf16> to vector<4x4x64xbf16>
    %3 = vector.shape_cast %2 : vector<4x4x64xbf16> to vector<16x64xbf16>
    %c0_3 = arith.constant 0 : index
    %c0_4 = arith.constant 0 : index
    %c0_5 = arith.constant 0 : index
    %4 = vector.load %arg4[%c0_3, %c0_4, %c0_5] : memref<4x64x32xbf16, #tpu.memory_space<vmem>>, vector<1x64x32xbf16>
    %5 = vector.shape_cast %4 : vector<1x64x32xbf16> to vector<64x32xbf16>
    %cst_6 = arith.constant dense<0.000000e+00> : vector<16x32xf32>
    %6 = tpu.matmul %3, %5, %cst_6 {dimension_numbers = #tpu.dot_dimension_numbers<[1], [0], [0], [1], [0, 0, 1, 1], [], []>} : vector<16x64xbf16>, vector<64x32xbf16>, vector<16x32xf32> -> vector<16x32xf32>
    %7 = arith.addf %0, %6 : vector<16x32xf32>
    %c0_7 = arith.constant 0 : index
    %c0_8 = arith.constant 0 : index
    %c0_9 = arith.constant 0 : index
    %c0_10 = arith.constant 0 : index
    %8 = vector.load %arg3[%c0_7, %c0_8, %c0_9, %c0_10] : memref<1x1x5x64xbf16, #tpu.memory_space<vmem>>, vector<1x1x4x64xbf16>
    %9 = vector.shape_cast %8 : vector<1x1x4x64xbf16> to vector<4x64xbf16>
    %10 = vector.extract_strided_slice %3 {offsets = [4, 0], sizes = [12, 64], strides = [1, 1]} : vector<16x64xbf16> to vector<12x64xbf16>
    %11 = tpu.concatenate %10, %9 in 0 : vector<12x64xbf16>, vector<4x64xbf16> -> vector<16x64xbf16>
    %c2 = arith.constant 2 : index
    %c0_11 = arith.constant 0 : index
    %c0_12 = arith.constant 0 : index
    %12 = vector.load %arg4[%c2, %c0_11, %c0_12] : memref<4x64x32xbf16, #tpu.memory_space<vmem>>, vector<1x64x32xbf16>
    %13 = vector.shape_cast %12 : vector<1x64x32xbf16> to vector<64x32xbf16>
    %cst_13 = arith.constant dense<0.000000e+00> : vector<16x32xf32>
    %14 = tpu.matmul %11, %13, %cst_13 {dimension_numbers = #tpu.dot_dimension_numbers<[1], [0], [0], [1], [0, 0, 1, 1], [], []>} : vector<16x64xbf16>, vector<64x32xbf16>, vector<16x32xf32> -> vector<16x32xf32>
    %15 = arith.addf %7, %14 : vector<16x32xf32>
    %c0_14 = arith.constant 0 : index
    %c0_15 = arith.constant 0 : index
    %c1 = arith.constant 1 : index
    %c0_16 = arith.constant 0 : index
    %16 = vector.load %arg2[%c0_14, %c0_15, %c1, %c0_16] : memref<1x4x5x64xbf16, #tpu.memory_space<vmem>>, vector<1x4x4x64xbf16>
    %17 = vector.shape_cast %16 : vector<1x4x4x64xbf16> to vector<4x4x64xbf16>
    %18 = vector.shape_cast %17 : vector<4x4x64xbf16> to vector<16x64xbf16>
    %c1_17 = arith.constant 1 : index
    %c0_18 = arith.constant 0 : index
    %c0_19 = arith.constant 0 : index
    %19 = vector.load %arg4[%c1_17, %c0_18, %c0_19] : memref<4x64x32xbf16, #tpu.memory_space<vmem>>, vector<1x64x32xbf16>
    %20 = vector.shape_cast %19 : vector<1x64x32xbf16> to vector<64x32xbf16>
    %cst_20 = arith.constant dense<0.000000e+00> : vector<16x32xf32>
    %21 = tpu.matmul %18, %20, %cst_20 {dimension_numbers = #tpu.dot_dimension_numbers<[1], [0], [0], [1], [0, 0, 1, 1], [], []>} : vector<16x64xbf16>, vector<64x32xbf16>, vector<16x32xf32> -> vector<16x32xf32>
    %22 = arith.addf %15, %21 : vector<16x32xf32>
    %c0_21 = arith.constant 0 : index
    %c0_22 = arith.constant 0 : index
    %c1_23 = arith.constant 1 : index
    %c0_24 = arith.constant 0 : index
    %23 = vector.load %arg3[%c0_21, %c0_22, %c1_23, %c0_24] : memref<1x1x5x64xbf16, #tpu.memory_space<vmem>>, vector<1x1x4x64xbf16>
    %24 = vector.shape_cast %23 : vector<1x1x4x64xbf16> to vector<4x64xbf16>
    %25 = vector.extract_strided_slice %18 {offsets = [4, 0], sizes = [12, 64], strides = [1, 1]} : vector<16x64xbf16> to vector<12x64xbf16>
    %26 = tpu.concatenate %25, %24 in 0 : vector<12x64xbf16>, vector<4x64xbf16> -> vector<16x64xbf16>
    %c3 = arith.constant 3 : index
    %c0_25 = arith.constant 0 : index
    %c0_26 = arith.constant 0 : index
    %27 = vector.load %arg4[%c3, %c0_25, %c0_26] : memref<4x64x32xbf16, #tpu.memory_space<vmem>>, vector<1x64x32xbf16>
    %28 = vector.shape_cast %27 : vector<1x64x32xbf16> to vector<64x32xbf16>
    %cst_27 = arith.constant dense<0.000000e+00> : vector<16x32xf32>
    %29 = tpu.matmul %26, %28, %cst_27 {dimension_numbers = #tpu.dot_dimension_numbers<[1], [0], [0], [1], [0, 0, 1, 1], [], []>} : vector<16x64xbf16>, vector<64x32xbf16>, vector<16x32xf32> -> vector<16x32xf32>
    %30 = arith.addf %22, %29 : vector<16x32xf32>
    %c0_28 = arith.constant 0 : index
    %c0_29 = arith.constant 0 : index
    %31 = vector.load %arg5[%c0_28, %c0_29] : memref<1x32xf32, #tpu.memory_space<vmem>>, vector<1x32xf32>
    %32 = vector.broadcast %31 : vector<1x32xf32> to vector<16x32xf32>
    %33 = arith.addf %30, %32 : vector<16x32xf32>
    %cst_30 = arith.constant 0.000000e+00 : f32
    %34 = vector.broadcast %cst_30 : f32 to vector<16x32xf32>
    %35 = arith.maximumf %33, %34 : vector<16x32xf32>
    %36 = vector.shape_cast %35 : vector<16x32xf32> to vector<1x4x4x32xf32>
    %37 = arith.truncf %36 : vector<1x4x4x32xf32> to vector<1x4x4x32xbf16>
    %c0_31 = arith.constant 0 : index
    %c0_32 = arith.constant 0 : index
    %c0_33 = arith.constant 0 : index
    %c0_34 = arith.constant 0 : index
    %38 = vector.load %arg6[%c0_31, %c0_32, %c0_33, %c0_34] : memref<1x4x4x32xbf16, #tpu.memory_space<vmem>>, vector<1x4x4x32xbf16>
    tpu.vector_store %arg6[%c0_31, %c0_32, %c0_33, %c0_34], %37 {strides = array<i32>} : memref<1x4x4x32xbf16, #tpu.memory_space<vmem>>, vector<1x4x4x32xbf16>,
    return
  }
  func.func @transform_0(%arg0: i32, %arg1: i32) -> (i32, i32, i32, i32) {
    %c0_i32 = arith.constant 0 : i32
    %c0_i32_0 = arith.constant 0 : i32
    %c0_i32_1 = arith.constant 0 : i32
    return %arg0, %arg1, %c0_i32, %c0_i32_0 : i32, i32, i32, i32
  }
  func.func @transform_1(%arg0: i32, %arg1: i32) -> (i32, i32, i32, i32) {
    %c1_i32 = arith.constant 1 : i32
    %0 = arith.addi %arg1, %c1_i32 : i32
    %c4_i32 = arith.constant 4 : i32
    %1 = arith.muli %0, %c4_i32 : i32
    %c0_i32 = arith.constant 0 : i32
    %c0_i32_0 = arith.constant 0 : i32
    %c0_i32_1 = arith.constant 0 : i32
    return %arg0, %1, %c0_i32, %c0_i32_0 : i32, i32, i32, i32
  }
  func.func @transform_2(%arg0: i32, %arg1: i32) -> (i32, i32, i32) {
    %c0_i32 = arith.constant 0 : i32
    %c0_i32_0 = arith.constant 0 : i32
    %c0_i32_1 = arith.constant 0 : i32
    %c0_i32_2 = arith.constant 0 : i32
    return %c0_i32, %c0_i32_0, %c0_i32_1 : i32, i32, i32
  }
  func.func @transform_3(%arg0: i32, %arg1: i32) -> (i32, i32) {
    %c0_i32 = arith.constant 0 : i32
    %c0_i32_0 = arith.constant 0 : i32
    %c0_i32_1 = arith.constant 0 : i32
    return %c0_i32, %c0_i32_0 : i32, i32
  }
  func.func @transform_4(%arg0: i32, %arg1: i32) -> (i32, i32, i32, i32) {
    %c0_i32 = arith.constant 0 : i32
    %c0_i32_0 = arith.constant 0 : i32
    %c0_i32_1 = arith.constant 0 : i32
    return %arg0, %arg1, %c0_i32, %c0_i32_0 : i32, i32, i32, i32
  }
}

module attributes {stable_mosaic.version = 11 : i64} {
  func.func @kernel(%arg0: i32, %arg1: i32, %arg2: memref<1x2x3x128xbf16, #tpu.memory_space<vmem>>, %arg3: memref<1x1x3x128xbf16, #tpu.memory_space<vmem>>, %arg4: memref<4x128x32xbf16, #tpu.memory_space<vmem>>, %arg5: memref<1x32xf32, #tpu.memory_space<vmem>>, %arg6: memref<1x2x2x32xbf16, #tpu.memory_space<vmem>>) attributes {dimension_semantics = [#tpu.dimension_semantics<parallel>, #tpu.dimension_semantics<parallel>], iteration_bounds = array<i64: 2, 1>, scalar_prefetch = 0 : i64, scratch_operands = 0 : i64, tpu.core_type = #tpu.core_type<tc>, window_params = [{transform_indices = @transform_0, window_bounds = array<i64: 1, 2, 3, 128>}, {transform_indices = @transform_1, window_bounds = array<i64: 1, 1, 3, 128>}, {pipeline_mode = #tpu.pipeline_mode<synchronous>, transform_indices = @transform_2, window_bounds = array<i64: 4, 128, 32>}, {pipeline_mode = #tpu.pipeline_mode<synchronous>, transform_indices = @transform_3, window_bounds = array<i64: 1, 32>}, {transform_indices = @transform_4, window_bounds = array<i64: 1, 2, 2, 32>}]} {
    %cst = arith.constant 0.000000e+00 : f32
    %0 = vector.broadcast %cst : f32 to vector<4x32xf32>
    %c0 = arith.constant 0 : index
    %c0_0 = arith.constant 0 : index
    %c0_1 = arith.constant 0 : index
    %c0_2 = arith.constant 0 : index
    %1 = vector.load %arg2[%c0, %c0_0, %c0_1, %c0_2] : memref<1x2x3x128xbf16, #tpu.memory_space<vmem>>, vector<1x2x2x128xbf16>
    %2 = vector.shape_cast %1 : vector<1x2x2x128xbf16> to vector<2x2x128xbf16>
    %3 = vector.shape_cast %2 : vector<2x2x128xbf16> to vector<4x128xbf16>
    %c0_3 = arith.constant 0 : index
    %c0_4 = arith.constant 0 : index
    %c0_5 = arith.constant 0 : index
    %4 = vector.load %arg4[%c0_3, %c0_4, %c0_5] : memref<4x128x32xbf16, #tpu.memory_space<vmem>>, vector<1x128x32xbf16>
    %5 = vector.shape_cast %4 : vector<1x128x32xbf16> to vector<128x32xbf16>
    %cst_6 = arith.constant dense<0.000000e+00> : vector<4x32xf32>
    %6 = tpu.matmul %3, %5, %cst_6 {dimension_numbers = #tpu.dot_dimension_numbers<[1], [0], [0], [1], [0, 0, 1, 1], [], []>} : vector<4x128xbf16>, vector<128x32xbf16>, vector<4x32xf32> -> vector<4x32xf32>
    %7 = arith.addf %0, %6 : vector<4x32xf32>
    %c0_7 = arith.constant 0 : index
    %c0_8 = arith.constant 0 : index
    %c0_9 = arith.constant 0 : index
    %c0_10 = arith.constant 0 : index
    %8 = vector.load %arg3[%c0_7, %c0_8, %c0_9, %c0_10] : memref<1x1x3x128xbf16, #tpu.memory_space<vmem>>, vector<1x1x2x128xbf16>
    %9 = vector.shape_cast %8 : vector<1x1x2x128xbf16> to vector<2x128xbf16>
    %10 = vector.extract_strided_slice %3 {offsets = [2, 0], sizes = [2, 128], strides = [1, 1]} : vector<4x128xbf16> to vector<2x128xbf16>
    %11 = tpu.concatenate %10, %9 in 0 : vector<2x128xbf16>, vector<2x128xbf16> -> vector<4x128xbf16>
    %c2 = arith.constant 2 : index
    %c0_11 = arith.constant 0 : index
    %c0_12 = arith.constant 0 : index
    %12 = vector.load %arg4[%c2, %c0_11, %c0_12] : memref<4x128x32xbf16, #tpu.memory_space<vmem>>, vector<1x128x32xbf16>
    %13 = vector.shape_cast %12 : vector<1x128x32xbf16> to vector<128x32xbf16>
    %cst_13 = arith.constant dense<0.000000e+00> : vector<4x32xf32>
    %14 = tpu.matmul %11, %13, %cst_13 {dimension_numbers = #tpu.dot_dimension_numbers<[1], [0], [0], [1], [0, 0, 1, 1], [], []>} : vector<4x128xbf16>, vector<128x32xbf16>, vector<4x32xf32> -> vector<4x32xf32>
    %15 = arith.addf %7, %14 : vector<4x32xf32>
    %c0_14 = arith.constant 0 : index
    %c0_15 = arith.constant 0 : index
    %c1 = arith.constant 1 : index
    %c0_16 = arith.constant 0 : index
    %16 = vector.load %arg2[%c0_14, %c0_15, %c1, %c0_16] : memref<1x2x3x128xbf16, #tpu.memory_space<vmem>>, vector<1x2x2x128xbf16>
    %17 = vector.shape_cast %16 : vector<1x2x2x128xbf16> to vector<2x2x128xbf16>
    %18 = vector.shape_cast %17 : vector<2x2x128xbf16> to vector<4x128xbf16>
    %c1_17 = arith.constant 1 : index
    %c0_18 = arith.constant 0 : index
    %c0_19 = arith.constant 0 : index
    %19 = vector.load %arg4[%c1_17, %c0_18, %c0_19] : memref<4x128x32xbf16, #tpu.memory_space<vmem>>, vector<1x128x32xbf16>
    %20 = vector.shape_cast %19 : vector<1x128x32xbf16> to vector<128x32xbf16>
    %cst_20 = arith.constant dense<0.000000e+00> : vector<4x32xf32>
    %21 = tpu.matmul %18, %20, %cst_20 {dimension_numbers = #tpu.dot_dimension_numbers<[1], [0], [0], [1], [0, 0, 1, 1], [], []>} : vector<4x128xbf16>, vector<128x32xbf16>, vector<4x32xf32> -> vector<4x32xf32>
    %22 = arith.addf %15, %21 : vector<4x32xf32>
    %c0_21 = arith.constant 0 : index
    %c0_22 = arith.constant 0 : index
    %c1_23 = arith.constant 1 : index
    %c0_24 = arith.constant 0 : index
    %23 = vector.load %arg3[%c0_21, %c0_22, %c1_23, %c0_24] : memref<1x1x3x128xbf16, #tpu.memory_space<vmem>>, vector<1x1x2x128xbf16>
    %24 = vector.shape_cast %23 : vector<1x1x2x128xbf16> to vector<2x128xbf16>
    %25 = vector.extract_strided_slice %18 {offsets = [2, 0], sizes = [2, 128], strides = [1, 1]} : vector<4x128xbf16> to vector<2x128xbf16>
    %26 = tpu.concatenate %25, %24 in 0 : vector<2x128xbf16>, vector<2x128xbf16> -> vector<4x128xbf16>
    %c3 = arith.constant 3 : index
    %c0_25 = arith.constant 0 : index
    %c0_26 = arith.constant 0 : index
    %27 = vector.load %arg4[%c3, %c0_25, %c0_26] : memref<4x128x32xbf16, #tpu.memory_space<vmem>>, vector<1x128x32xbf16>
    %28 = vector.shape_cast %27 : vector<1x128x32xbf16> to vector<128x32xbf16>
    %cst_27 = arith.constant dense<0.000000e+00> : vector<4x32xf32>
    %29 = tpu.matmul %26, %28, %cst_27 {dimension_numbers = #tpu.dot_dimension_numbers<[1], [0], [0], [1], [0, 0, 1, 1], [], []>} : vector<4x128xbf16>, vector<128x32xbf16>, vector<4x32xf32> -> vector<4x32xf32>
    %30 = arith.addf %22, %29 : vector<4x32xf32>
    %c0_28 = arith.constant 0 : index
    %c0_29 = arith.constant 0 : index
    %31 = vector.load %arg5[%c0_28, %c0_29] : memref<1x32xf32, #tpu.memory_space<vmem>>, vector<1x32xf32>
    %32 = vector.broadcast %31 : vector<1x32xf32> to vector<4x32xf32>
    %33 = arith.addf %30, %32 : vector<4x32xf32>
    %cst_30 = arith.constant 0.000000e+00 : f32
    %34 = vector.broadcast %cst_30 : f32 to vector<4x32xf32>
    %35 = arith.maximumf %33, %34 : vector<4x32xf32>
    %36 = vector.shape_cast %35 : vector<4x32xf32> to vector<1x2x2x32xf32>
    %37 = arith.truncf %36 : vector<1x2x2x32xf32> to vector<1x2x2x32xbf16>
    %c0_31 = arith.constant 0 : index
    %c0_32 = arith.constant 0 : index
    %c0_33 = arith.constant 0 : index
    %c0_34 = arith.constant 0 : index
    %38 = vector.load %arg6[%c0_31, %c0_32, %c0_33, %c0_34] : memref<1x2x2x32xbf16, #tpu.memory_space<vmem>>, vector<1x2x2x32xbf16>
    tpu.vector_store %arg6[%c0_31, %c0_32, %c0_33, %c0_34], %37 {strides = array<i32>} : memref<1x2x2x32xbf16, #tpu.memory_space<vmem>>, vector<1x2x2x32xbf16>,
    return
  }
  func.func @transform_0(%arg0: i32, %arg1: i32) -> (i32, i32, i32, i32) {
    %c0_i32 = arith.constant 0 : i32
    %c0_i32_0 = arith.constant 0 : i32
    %c0_i32_1 = arith.constant 0 : i32
    return %arg0, %arg1, %c0_i32, %c0_i32_0 : i32, i32, i32, i32
  }
  func.func @transform_1(%arg0: i32, %arg1: i32) -> (i32, i32, i32, i32) {
    %c1_i32 = arith.constant 1 : i32
    %0 = arith.addi %arg1, %c1_i32 : i32
    %c2_i32 = arith.constant 2 : i32
    %1 = arith.muli %0, %c2_i32 : i32
    %c0_i32 = arith.constant 0 : i32
    %c0_i32_0 = arith.constant 0 : i32
    %c0_i32_1 = arith.constant 0 : i32
    return %arg0, %1, %c0_i32, %c0_i32_0 : i32, i32, i32, i32
  }
  func.func @transform_2(%arg0: i32, %arg1: i32) -> (i32, i32, i32) {
    %c0_i32 = arith.constant 0 : i32
    %c0_i32_0 = arith.constant 0 : i32
    %c0_i32_1 = arith.constant 0 : i32
    %c0_i32_2 = arith.constant 0 : i32
    return %c0_i32, %c0_i32_0, %c0_i32_1 : i32, i32, i32
  }
  func.func @transform_3(%arg0: i32, %arg1: i32) -> (i32, i32) {
    %c0_i32 = arith.constant 0 : i32
    %c0_i32_0 = arith.constant 0 : i32
    %c0_i32_1 = arith.constant 0 : i32
    return %c0_i32, %c0_i32_0 : i32, i32
  }
  func.func @transform_4(%arg0: i32, %arg1: i32) -> (i32, i32, i32, i32) {
    %c0_i32 = arith.constant 0 : i32
    %c0_i32_0 = arith.constant 0 : i32
    %c0_i32_1 = arith.constant 0 : i32
    return %arg0, %arg1, %c0_i32, %c0_i32_0 : i32, i32, i32, i32
  }
}

module attributes {stable_mosaic.version = 11 : i64} {
  func.func @kernel(%arg0: i32, %arg1: i32, %arg2: memref<1x1x2x128xbf16, #tpu.memory_space<vmem>>, %arg3: memref<1x1x2x128xbf16, #tpu.memory_space<vmem>>, %arg4: memref<4x128x32xbf16, #tpu.memory_space<vmem>>, %arg5: memref<1x32xf32, #tpu.memory_space<vmem>>, %arg6: memref<1x1x1x32xbf16, #tpu.memory_space<vmem>>) attributes {dimension_semantics = [#tpu.dimension_semantics<parallel>, #tpu.dimension_semantics<parallel>], iteration_bounds = array<i64: 2, 1>, scalar_prefetch = 0 : i64, scratch_operands = 0 : i64, tpu.core_type = #tpu.core_type<tc>, window_params = [{transform_indices = @transform_0, window_bounds = array<i64: 1, 1, 2, 128>}, {transform_indices = @transform_1, window_bounds = array<i64: 1, 1, 2, 128>}, {pipeline_mode = #tpu.pipeline_mode<synchronous>, transform_indices = @transform_2, window_bounds = array<i64: 4, 128, 32>}, {pipeline_mode = #tpu.pipeline_mode<synchronous>, transform_indices = @transform_3, window_bounds = array<i64: 1, 32>}, {transform_indices = @transform_4, window_bounds = array<i64: 1, 1, 1, 32>}]} {
    %cst = arith.constant 0.000000e+00 : f32
    %0 = vector.broadcast %cst : f32 to vector<1x32xf32>
    %c0 = arith.constant 0 : index
    %c0_0 = arith.constant 0 : index
    %c0_1 = arith.constant 0 : index
    %c0_2 = arith.constant 0 : index
    %1 = vector.load %arg2[%c0, %c0_0, %c0_1, %c0_2] : memref<1x1x2x128xbf16, #tpu.memory_space<vmem>>, vector<1x1x1x128xbf16>
    %2 = vector.shape_cast %1 : vector<1x1x1x128xbf16> to vector<1x1x128xbf16>
    %3 = vector.shape_cast %2 : vector<1x1x128xbf16> to vector<1x128xbf16>
    %c0_3 = arith.constant 0 : index
    %c0_4 = arith.constant 0 : index
    %c0_5 = arith.constant 0 : index
    %4 = vector.load %arg4[%c0_3, %c0_4, %c0_5] : memref<4x128x32xbf16, #tpu.memory_space<vmem>>, vector<1x128x32xbf16>
    %5 = vector.shape_cast %4 : vector<1x128x32xbf16> to vector<128x32xbf16>
    %cst_6 = arith.constant dense<0.000000e+00> : vector<1x32xf32>
    %6 = tpu.matmul %3, %5, %cst_6 {dimension_numbers = #tpu.dot_dimension_numbers<[1], [0], [0], [1], [0, 0, 1, 1], [], []>} : vector<1x128xbf16>, vector<128x32xbf16>, vector<1x32xf32> -> vector<1x32xf32>
    %7 = arith.addf %0, %6 : vector<1x32xf32>
    %c0_7 = arith.constant 0 : index
    %c0_8 = arith.constant 0 : index
    %c0_9 = arith.constant 0 : index
    %c0_10 = arith.constant 0 : index
    %8 = vector.load %arg3[%c0_7, %c0_8, %c0_9, %c0_10] : memref<1x1x2x128xbf16, #tpu.memory_space<vmem>>, vector<1x1x1x128xbf16>
    %9 = vector.shape_cast %8 : vector<1x1x1x128xbf16> to vector<1x128xbf16>
    %c2 = arith.constant 2 : index
    %c0_11 = arith.constant 0 : index
    %c0_12 = arith.constant 0 : index
    %10 = vector.load %arg4[%c2, %c0_11, %c0_12] : memref<4x128x32xbf16, #tpu.memory_space<vmem>>, vector<1x128x32xbf16>
    %11 = vector.shape_cast %10 : vector<1x128x32xbf16> to vector<128x32xbf16>
    %cst_13 = arith.constant dense<0.000000e+00> : vector<1x32xf32>
    %12 = tpu.matmul %9, %11, %cst_13 {dimension_numbers = #tpu.dot_dimension_numbers<[1], [0], [0], [1], [0, 0, 1, 1], [], []>} : vector<1x128xbf16>, vector<128x32xbf16>, vector<1x32xf32> -> vector<1x32xf32>
    %13 = arith.addf %7, %12 : vector<1x32xf32>
    %c0_14 = arith.constant 0 : index
    %c0_15 = arith.constant 0 : index
    %c1 = arith.constant 1 : index
    %c0_16 = arith.constant 0 : index
    %14 = vector.load %arg2[%c0_14, %c0_15, %c1, %c0_16] : memref<1x1x2x128xbf16, #tpu.memory_space<vmem>>, vector<1x1x1x128xbf16>
    %15 = vector.shape_cast %14 : vector<1x1x1x128xbf16> to vector<1x1x128xbf16>
    %16 = vector.shape_cast %15 : vector<1x1x128xbf16> to vector<1x128xbf16>
    %c1_17 = arith.constant 1 : index
    %c0_18 = arith.constant 0 : index
    %c0_19 = arith.constant 0 : index
    %17 = vector.load %arg4[%c1_17, %c0_18, %c0_19] : memref<4x128x32xbf16, #tpu.memory_space<vmem>>, vector<1x128x32xbf16>
    %18 = vector.shape_cast %17 : vector<1x128x32xbf16> to vector<128x32xbf16>
    %cst_20 = arith.constant dense<0.000000e+00> : vector<1x32xf32>
    %19 = tpu.matmul %16, %18, %cst_20 {dimension_numbers = #tpu.dot_dimension_numbers<[1], [0], [0], [1], [0, 0, 1, 1], [], []>} : vector<1x128xbf16>, vector<128x32xbf16>, vector<1x32xf32> -> vector<1x32xf32>
    %20 = arith.addf %13, %19 : vector<1x32xf32>
    %c0_21 = arith.constant 0 : index
    %c0_22 = arith.constant 0 : index
    %c1_23 = arith.constant 1 : index
    %c0_24 = arith.constant 0 : index
    %21 = vector.load %arg3[%c0_21, %c0_22, %c1_23, %c0_24] : memref<1x1x2x128xbf16, #tpu.memory_space<vmem>>, vector<1x1x1x128xbf16>
    %22 = vector.shape_cast %21 : vector<1x1x1x128xbf16> to vector<1x128xbf16>
    %c3 = arith.constant 3 : index
    %c0_25 = arith.constant 0 : index
    %c0_26 = arith.constant 0 : index
    %23 = vector.load %arg4[%c3, %c0_25, %c0_26] : memref<4x128x32xbf16, #tpu.memory_space<vmem>>, vector<1x128x32xbf16>
    %24 = vector.shape_cast %23 : vector<1x128x32xbf16> to vector<128x32xbf16>
    %cst_27 = arith.constant dense<0.000000e+00> : vector<1x32xf32>
    %25 = tpu.matmul %22, %24, %cst_27 {dimension_numbers = #tpu.dot_dimension_numbers<[1], [0], [0], [1], [0, 0, 1, 1], [], []>} : vector<1x128xbf16>, vector<128x32xbf16>, vector<1x32xf32> -> vector<1x32xf32>
    %26 = arith.addf %20, %25 : vector<1x32xf32>
    %c0_28 = arith.constant 0 : index
    %c0_29 = arith.constant 0 : index
    %27 = vector.load %arg5[%c0_28, %c0_29] : memref<1x32xf32, #tpu.memory_space<vmem>>, vector<1x32xf32>
    %28 = arith.addf %26, %27 : vector<1x32xf32>
    %cst_30 = arith.constant 0.000000e+00 : f32
    %29 = vector.broadcast %cst_30 : f32 to vector<1x32xf32>
    %30 = arith.maximumf %28, %29 : vector<1x32xf32>
    %31 = vector.shape_cast %30 : vector<1x32xf32> to vector<1x1x1x32xf32>
    %32 = arith.truncf %31 : vector<1x1x1x32xf32> to vector<1x1x1x32xbf16>
    %c0_31 = arith.constant 0 : index
    %c0_32 = arith.constant 0 : index
    %c0_33 = arith.constant 0 : index
    %c0_34 = arith.constant 0 : index
    %33 = vector.load %arg6[%c0_31, %c0_32, %c0_33, %c0_34] : memref<1x1x1x32xbf16, #tpu.memory_space<vmem>>, vector<1x1x1x32xbf16>
    tpu.vector_store %arg6[%c0_31, %c0_32, %c0_33, %c0_34], %32 {strides = array<i32>} : memref<1x1x1x32xbf16, #tpu.memory_space<vmem>>, vector<1x1x1x32xbf16>,
    return
  }
  func.func @transform_0(%arg0: i32, %arg1: i32) -> (i32, i32, i32, i32) {
    %c0_i32 = arith.constant 0 : i32
    %c0_i32_0 = arith.constant 0 : i32
    %c0_i32_1 = arith.constant 0 : i32
    return %arg0, %arg1, %c0_i32, %c0_i32_0 : i32, i32, i32, i32
  }
  func.func @transform_1(%arg0: i32, %arg1: i32) -> (i32, i32, i32, i32) {
    %c1_i32 = arith.constant 1 : i32
    %0 = arith.addi %arg1, %c1_i32 : i32
    %c1_i32_0 = arith.constant 1 : i32
    %1 = arith.muli %0, %c1_i32_0 : i32
    %c0_i32 = arith.constant 0 : i32
    %c0_i32_1 = arith.constant 0 : i32
    %c0_i32_2 = arith.constant 0 : i32
    return %arg0, %1, %c0_i32, %c0_i32_1 : i32, i32, i32, i32
  }
  func.func @transform_2(%arg0: i32, %arg1: i32) -> (i32, i32, i32) {
    %c0_i32 = arith.constant 0 : i32
    %c0_i32_0 = arith.constant 0 : i32
    %c0_i32_1 = arith.constant 0 : i32
    %c0_i32_2 = arith.constant 0 : i32
    return %c0_i32, %c0_i32_0, %c0_i32_1 : i32, i32, i32
  }
  func.func @transform_3(%arg0: i32, %arg1: i32) -> (i32, i32) {
    %c0_i32 = arith.constant 0 : i32
    %c0_i32_0 = arith.constant 0 : i32
    %c0_i32_1 = arith.constant 0 : i32
    return %c0_i32, %c0_i32_0 : i32, i32
  }
  func.func @transform_4(%arg0: i32, %arg1: i32) -> (i32, i32, i32, i32) {
    %c0_i32 = arith.constant 0 : i32
    %c0_i32_0 = arith.constant 0 : i32
    %c0_i32_1 = arith.constant 0 : i32
    return %arg0, %arg1, %c0_i32, %c0_i32_0 : i32, i32, i32, i32
  }
}

</mosaic_0001>

<bundles_post_ra>
// kernel: torchvision_backbone_forward.6
= control target key start
LH: loop header
LB: loop body
LE: loop exit
PB: predicated region body
PF: predicated region fallthrough
CT: control target
= control target key end

     0   :  { %s1295_s15 = smov 0   ;;  %s1297_s16 = smov 0   ;;  %s1450_s0 = inlined_call_operand.vmem [shape: bf16[2,9,9,32], index: 0, kind: input, shape index: {}, may-alias: {0,1}]   ;;  %s1451_s1 = inlined_call_operand.vmem [shape: bf16[2,9,9,32], index: 1, kind: input, shape index: {}, may-alias: {0,1}]   ;;  %s1452_s2 = inlined_call_operand.vmem [shape: bf16[4,32,16], index: 2, kind: input, shape index: {}]   ;;  %s1453_s3 = inlined_call_operand.vmem [shape: f32[1,16], index: 3, kind: input, shape index: {}]   ;;  %s1454_s4 = inlined_call_operand.vmem [shape: bf16[2,8,8,16], index: 4, kind: output, shape index: {}]  }
   0x1   :  { %s1299_s17 = smov 0  }
   0x2 LB: > { %s26_s18 = sadd.s32 1, %s1264_s16  ;;  %p1064_p0 = scmp.ge.s32.totalorder %s1268_s17, 1  ;;  %s1268_s17 = sphi %s1299_s17, %s14_s17   ;;  %s1264_s16 = sphi %s1297_s16, %s1458_s16   ;;  %s1260_s15 = sphi %s1295_s15, %s1457_s15  }
   0x3   : > { %p28_p1 = scmp.ge.s32.totalorder %s26_s18, 2  ;;  %p218_p2 = scmp.lt.s32.totalorder %s1268_s17, 3 }
   0x5   : > { %s1460_s18 = smov (%p28_p1, %s26_s18), 0  ;;  %p219_p3 = pnand %p1064_p0, %p218_p2 }
   0x6   : > { %p275_p4 = scmp.lt.s32.totalorder (!%p219_p3), %s1260_s15, 1 }
   0x7   : > { %222 = sbr.rel (%p219_p3) target bundleno = 257 (0x101), region = 36 }
   0xc   : > { %v1228_v0 = vld [vmem:[%s1452_s2 + $0x28] sm:$0xff]   ;;  %v1230_v2 = vld [vmem:[%s1452_s2 + $0x20] sm:$0xff]   ;;  %s1462_s15 = smov (!%p275_p4, %s1260_s15), 1  ;;  %v1236_v4 = vld [vmem:[%s1452_s2 + $0x18] sm:$0xff]   ;;  %vm369_vm0 = vcmask 261120   ;;  %vm348_vm1 = vcmask 1043456  }
   0xd   : > { %v1229_v1 = vld [vmem:[%s1452_s2 + $0x8] sm:$0xff]   ;;  %1153 = vmatprep.subr.bf16.mxu0 %v1228_v0  ;;  %v1231_v3 = vld [vmem:[%s1452_s2] sm:$0xff]   ;;  %s1201_s27 = smul.u32 72, %s1462_s15  ;;  %v1237_v5 = vld [vmem:[%s1452_s2 + $0x38] sm:$0xff]   ;;  %vm557_vm2 = vsmask.f32 3328 }
   0xe   : > { %1165 = vmatprep.subr.bf16.mxu1 %v1229_v1  ;;  %1154 = vmatpush3.bf16.msra.mxu0 %v1228_v0  ;;  %v1243_v14 = vld [vmem:[%s1452_s2 + $0x10] sm:$0xff]   ;;  %vm558_vm3 = vsmask.f32 7440  ;;  %s1128_s23 = sshll.u32 %s1462_s15, 5  ;;  %vm940_vm5 = vcmask 125952  }
   0xf   : > { %1166 = vmatpush3.bf16.msra.mxu1 %v1229_v1  ;;  %1155 = vmatprep.subr.bf16.mxu0 %v1230_v2  ;;  %s1337_s8 = scalar_lea.vmem %s1450_s0, %s1201_s27  ;;  %s1127_s9 = sadd.s32 64, %s1201_s27  ;;  %v1244_v22 = vld [vmem:[%s1452_s2 + $0x30] sm:$0xff]   ;;  %vm1378_vm4 = vmor %vm557_vm2, %vm558_vm3 }
  0x10   : > { %1167 = vmatprep.subr.bf16.mxu1 %v1231_v3  ;;  %v315_v6 = vld [vmem:[%s1337_s8 + $0x8] sm:$0xf]  ;;  %v316_v7 = vld [vmem:[%s1337_s8 + $0x10] sm:$0xf]  ;;  %v317_v8 = vld [vmem:[%s1337_s8 + $0x18] sm:$0xf]  ;;  %s1345_s12 = scalar_lea.vmem %s1451_s1, %s1127_s9  ;;  %s1423_s26 = scalar_lea.vmem %s1454_s4, %s1128_s23 }
  0x11   : > { %v318_v9 = vld [vmem:[%s1337_s8 + $0x20] sm:$0xf]  ;;  %v1069_v10 = vcombine.low %v315_v6, %v316_v7  ;;  %v1085_v11 = vcombine.low %v316_v7, %v317_v8  ;;  %v319_v13 = vld [vmem:[%s1337_s8 + $0x28] sm:$0xf]  ;;  %v320_v17 = vld [vmem:[%s1337_s8 + $0x30] sm:$0xf] }
  0x12   : > { %1156 = vmatpush3.bf16.msra.mxu0 %v1230_v2  ;;  %v314_v12 = vld [vmem:[%s1337_s8] sm:$0xf]  ;;  %v1070_v15 = vcombine.low %v317_v8, %v318_v9  ;;  %v321_v18 = vld [vmem:[%s1337_s8 + $0x38] sm:$0xf]  ;;  %v1071_v19 = vcombine.low %v319_v13, %v320_v17  ;;  %v1086_v20 = vcombine.low %v318_v9, %v319_v13  ;;  %v542_v25 = vld [vmem:[%s1337_s8 + $0x4] sm:$0x1] }
  0x13   : > { %1168 = vmatpush3.bf16.msra.mxu1 %v1231_v3  ;;  %1177 = vmatprep.subr.bf16.mxu0 %v1236_v4  ;;  %v1084_v16 = vcombine.low %v314_v12, %v315_v6  ;;  %v1241_v21 = vld [vmem:[%s1345_s12] ss:$0 sps:$4 sm:$0xff]   ;;  %v1072_v23 = vcombine.low %v321_v18, %v321_v18  ;;  %v543_v26 = vld [vmem:[%s1337_s8 + $0x8] sm:$0xf]  ;;  %v544_v27 = vld [vmem:[%s1337_s8 + $0xc] sm:$0x1]  ;;  %v1087_v33 = vcombine.low %v320_v17, %v321_v18 }
  0x14   : > { %1189 = vmatprep.subr.bf16.mxu1 %v1237_v5  ;;  %1157 = vmatprep.mubr.msk.bf16.mxu0 %vm369_vm0, %v1069_v10  ;;  %v541_v24 = vld [vmem:[%s1337_s8] sm:$0xf]  ;;  %v570_v30 = vshll.u32 %v542_v25, 16  ;;  %v575_v31 = vshrl.u32 %v543_v26, 16  ;;  %v545_v32 = vld [vmem:[%s1337_s8 + $0x10] sm:$0xf] }
  0x15   : > { %1169 = vmatprep.mubr.msk.bf16.mxu1 %vm369_vm0, %v1084_v16  ;;  %1158 = vmatmul.mubr.msk.bf16.vlgmr.msra.gmra.mxu0 %vm369_vm0, %v1070_v15  ;;  %v561_v28 = vshrl.u32 %v541_v24, 16  ;;  %v564_v29 = vshll.u32 %v541_v24, 16  ;;  %v578_v34 = vshll.u32 %v543_v26, 16  ;;  %v584_v35 = vshll.u32 %v544_v27, 16  ;;  %v546_v36 = vld [vmem:[%s1337_s8 + $0x14] sm:$0x1] }
  0x16   : > { %1170 = vmatmul.mubr.msk.bf16.vlgmr.msra.gmra.mxu1 %vm369_vm0, %v1085_v11  ;;  %1178 = vmatpush3.bf16.msra.mxu0 %v1236_v4  ;;  %v547_v37 = vld [vmem:[%s1337_s8 + $0x18] sm:$0xf]  ;;  %v351_v38 = vsel %vm348_vm1, %v1072_v23, %v1241_v21  ;;  %v577_v41 = vrot.slane %v575_v31, 4  ;;  %v548_v42 = vld [vmem:[%s1337_s8 + $0x1c] sm:$0x1]  ;;  %v572_v43 = vrot.slane %v570_v30, 5 }
  0x17   : > { %1190 = vmatpush3.bf16.msra.mxu1 %v1237_v5  ;;  %1161 = vmatprep.mubr.msk.bf16.mxu0 %vm369_vm0, %v1071_v19  ;;  %v563_v39 = vrot.slane %v561_v28, 4  ;;  %v566_v40 = vrot.slane %v564_v29, 5  ;;  %v580_v44 = vrot.slane %v578_v34, 5  ;;  %v586_v45 = vrot.slane %v584_v35, 5  ;;  %v549_v47 = vld [vmem:[%s1337_s8 + $0x20] sm:$0xf] }
  0x18   : > { %1173 = vmatprep.mubr.msk.bf16.mxu1 %vm369_vm0, %v1086_v20  ;;  %1179 = vmatprep.subr.bf16.mxu0 %v1243_v14  ;;  %v589_v48 = vshrl.u32 %v545_v32, 16  ;;  %v592_v49 = vshll.u32 %v545_v32, 16  ;;  %v598_v50 = vshll.u32 %v546_v36, 16  ;;  %v550_v53 = vld [vmem:[%s1337_s8 + $0x24] sm:$0x1]  ;;  %v603_v54 = vshrl.u32 %v547_v37, 16 }
  0x19   : > { %1191 = vmatprep.subr.bf16.mxu1 %v1244_v22  ;;  %v567_v46 = vor.u32 %v566_v40, %v563_v39  ;;  %v581_v52 = vor.u32 %v580_v44, %v577_v41  ;;  %v606_v55 = vshll.u32 %v547_v37, 16  ;;  %v612_v56 = vshll.u32 %v548_v42, 16  ;;  %v551_v61 = vld [vmem:[%s1337_s8 + $0x28] sm:$0xf]  ;;  %v552_v9 = vld [vmem:[%s1337_s8 + $0x2c] sm:$0x1] }
  0x1a   : > { %1180 = vmatpush3.bf16.msra.mxu0 %v1243_v14  ;;  %v591_v58 = vrot.slane %v589_v48, 4  ;;  %v594_v59 = vrot.slane %v592_v49, 5  ;;  %v600_v60 = vrot.slane %v598_v50, 5  ;;  %v605_v63 = vrot.slane %v603_v54, 4  ;;  %v553_v11 = vld [vmem:[%s1337_s8 + $0x30] sm:$0xf] }
  0x1b   : > { %1192 = vmatpush3.bf16.msra.mxu1 %v1244_v22  ;;  %v568_v57 = vrot.slane %v567_v46, 4  ;;  %v582_v62 = vrot.slane %v581_v52, 4  ;;  %v608_v0 = vrot.slane %v606_v55, 5  ;;  %v614_v1 = vrot.slane %v612_v56, 5  ;;  %v554_v20 = vld [vmem:[%s1337_s8 + $0x34] sm:$0x1] }
  0x1c   : > { %v595_v3 = vor.u32 %v594_v59, %v591_v58  ;;  %v617_v4 = vshrl.u32 %v549_v47, 16  ;;  %v620_v5 = vshll.u32 %v549_v47, 16  ;;  %v626_v8 = vshll.u32 %v550_v53, 16  ;;  %v555_v25 = vld [vmem:[%s1337_s8 + $0x38] sm:$0xf] }
  0x1d   : > { %1162 = vmatmul.mubr.msk.bf16.gmra.mxu0 %vm369_vm0, %v351_v38  ;;  %v573_v2 = vsel %vm1378_vm4, %v568_v57, %v572_v43  ;;  %v587_v6 = vsel %vm1378_vm4, %v582_v62, %v586_v45  ;;  %v609_v7 = vor.u32 %v608_v0, %v605_v63  ;;  %v631_v10 = vshrl.u32 %v551_v61, 16  ;;  %v1245_v26 = vld [vmem:[%s1345_s12] sm:$0x1f]   ;;  %v556_v31 = vld [vmem:[%s1337_s8 + $0x3c] sm:$0x1] }
  0x1e   : > { %1174 = vmatmul.mubr.msk.bf16.gmra.mxu1 %vm369_vm0, %v1087_v33  ;;  %v1098_v12 = vcombine.low %v573_v2, %v587_v6  ;;  %v596_v13 = vrot.slane %v595_v3, 4  ;;  %v619_v14 = vrot.slane %v617_v4, 4  ;;  %v622_v15 = vrot.slane %v620_v5, 5 }
  0x1f   : > { %v610_v16 = vrot.slane %v609_v7, 4  ;;  %v628_v17 = vrot.slane %v626_v8, 5  ;;  %v633_v18 = vrot.slane %v631_v10, 4  ;;  %v634_v19 = vshll.u32 %v551_v61, 16 }
  0x20   : > { %1181 = vmatprep.mubr.msk.bf16.mxu0 %vm369_vm0, %v1098_v12  ;;  %v601_v21 = vsel %vm1378_vm4, %v596_v13, %v600_v60  ;;  %v623_v22 = vor.u32 %v622_v15, %v619_v14  ;;  %v640_v23 = vshll.u32 %v552_v9, 16  ;;  %v645_v24 = vshrl.u32 %v553_v11, 16 }
  0x21   : > { %v615_v27 = vsel %vm1378_vm4, %v610_v16, %v614_v1  ;;  %v1108_v28 = vcombine.low %v587_v6, %v601_v21  ;;  %v636_v29 = vrot.slane %v634_v19, 5  ;;  %v648_v30 = vshll.u32 %v553_v11, 16 }
  0x22   : > { %v624_v32 = vrot.slane %v623_v22, 4  ;;  %v1099_v33 = vcombine.low %v601_v21, %v615_v27  ;;  %v642_v34 = vrot.slane %v640_v23, 5  ;;  %v647_v35 = vrot.slane %v645_v24, 4 }
  0x23   : > { %1193 = vmatprep.mubr.msk.bf16.mxu1 %vm369_vm0, %v1108_v28  ;;  %v637_v36 = vor.u32 %v636_v29, %v633_v18  ;;  %v650_v37 = vrot.slane %v648_v30, 5  ;;  %v654_v38 = vshll.u32 %v554_v20, 16  ;;  %v659_v39 = vshrl.u32 %v555_v25, 16 }
  0x24   : > { %v629_v40 = vsel %vm1378_vm4, %v624_v32, %v628_v17  ;;  %v662_v41 = vshll.u32 %v555_v25, 16  ;;  %v668_v42 = vshll.u32 %v556_v31, 16  ;;  %v798_v43 = vshrl.u32 %v1245_v26, 16  ;;  %v1123_v25 = vld [vmem:[%s1453_s3] ss:$0 sm:$0xff] }
  0x25   : > { %1182 = vmatmul.mubr.msk.bf16.vlgmr.msra.gmra.mxu0 %vm369_vm0, %v1099_v33  ;;  %v1109_v44 = vcombine.low %v615_v27, %v629_v40  ;;  %v638_v45 = vrot.slane %v637_v36, 4  ;;  %v651_v46 = vor.u32 %v650_v37, %v647_v35  ;;  %v656_v47 = vrot.slane %v654_v38, 5 }
  0x26   : > { %v661_v48 = vrot.slane %v659_v39, 4  ;;  %v664_v49 = vrot.slane %v662_v41, 5  ;;  %v800_v53 = vrot.slane %v798_v43, 4  ;;  %v801_v54 = vshll.u32 %v1245_v26, 16 }
  0x27   : > { %1194 = vmatmul.mubr.msk.bf16.vlgmr.msra.gmra.mxu1 %vm369_vm0, %v1109_v44  ;;  %v643_v50 = vsel %vm1378_vm4, %v638_v45, %v642_v34  ;;  %v652_v52 = vrot.slane %v651_v46, 4  ;;  %v670_v57 = vrot.slane %v668_v42, 5 }
  0x28   : > { %v1100_v55 = vcombine.low %v629_v40, %v643_v50  ;;  %v665_v56 = vor.u32 %v664_v49, %v661_v48  ;;  %v803_v59 = vrot.slane %v801_v54, 5 }
  0x29   : > { %v657_v58 = vsel %vm1378_vm4, %v652_v52, %v656_v47 }
  0x2a   : > { %1185 = vmatprep.mubr.msk.bf16.mxu0 %vm369_vm0, %v1100_v55  ;;  %v1110_v60 = vcombine.low %v643_v50, %v657_v58  ;;  %v666_v61 = vrot.slane %v665_v56, 4  ;;  %v804_v62 = vor.u32 %v803_v59, %v800_v53 }
  0x2c   : > { %1197 = vmatprep.mubr.msk.bf16.mxu1 %vm369_vm0, %v1110_v60  ;;  %v671_v63 = vsel %vm1378_vm4, %v666_v61, %v670_v57 }
  0x2d   : > { %v1101_v0 = vcombine.low %v657_v58, %v671_v63  ;;  %v1111_v1 = vcombine.low %v671_v63, %v671_v63 }
  0x2f   : > { %1186 = vmatmul.mubr.msk.bf16.gmra.mxu0 %vm369_vm0, %v1101_v0  ;;  %v807_v2 = vsel %vm348_vm1, %v1111_v1, %v804_v62 }
  0x30   : > { %1198 = vmatmul.mubr.msk.bf16.gmra.mxu1 %vm369_vm0, %v807_v2 }
  0xd5   : > { %v1159_v3 = vpop.f32.mrf.mxu0 }
  0xd6   : > { %v1171_v4 = vpop.f32.mrf.mxu1 }
  0xd7   : > { %v415_v5 = vpop.f32.mrf.mxu0  ;;  %v519_v17 = vadd.f32 %v1171_v4, %v1159_v3 }
  0xd8   : > { %v510_v6 = vpop.f32.mrf.mxu1 }
  0xd9   : > { %v1160_v7 = vpop.f32.mrf.mxu0  ;;  %v511_v20 = vadd.f32 %v510_v6, %v415_v5 }
  0xda   : > { %v1172_v8 = vpop.f32.mrf.mxu1 }
  0xdb   : > { %v418_v9 = vpop.f32.mrf.mxu0  ;;  %v522_v23 = vadd.f32 %v1172_v8, %v1160_v7 }
  0xdc   : > { %v513_v10 = vpop.f32.mrf.mxu1 }
  0xdd   : > { %v1163_v11 = vpop.f32.mrf.mxu0  ;;  %v514_v29 = vadd.f32 %v513_v10, %v418_v9 }
  0xde   : > { %v1175_v12 = vpop.f32.mrf.mxu1 }
  0xdf   : > { %v431_v51 = vpop.f32.mrf.mxu0  ;;  %v535_v40 = vadd.f32 %v1175_v12, %v1163_v11 }
  0xe0   : > { %v526_v13 = vpop.f32.mrf.mxu1 }
  0xe1   : > { %v1164_v14 = vpop.f32.mrf.mxu0  ;;  %v527_v46 = vadd.f32 %v526_v13, %v431_v51 }
  0xe2   : > { %v1176_v15 = vpop.f32.mrf.mxu1 }
  0xe3   : > { %v434_v16 = vpop.f32.mrf.mxu0  ;;  %v538_v54 = vadd.f32 %v1176_v15, %v1164_v14 }
  0xe4   : > { %v529_v18 = vpop.f32.mrf.mxu1 }
  0xe5   : > { %v1183_v19 = vpop.f32.mrf.mxu0  ;;  %v530_v61 = vadd.f32 %v529_v18, %v434_v16 }
  0xe6   : > { %v780_v21 = vadd.f32 %v1183_v19, %v519_v17 }
  0xe7   : > { %v747_v22 = vpop.f32.mrf.mxu0  ;;  %v1195_v24 = vpop.f32.mrf.mxu1 }
  0xe8   : > { %v778_v26 = vadd.f32 %v747_v22, %v511_v20  ;;  %v903_v27 = vadd.f32 %v1195_v24, %v780_v21 }
  0xe9   : > { %v1184_v28 = vpop.f32.mrf.mxu0  ;;  %v870_v30 = vpop.f32.mrf.mxu1 }
  0xea   : > { %v781_v31 = vadd.f32 %v1184_v28, %v522_v23  ;;  %v918_v32 = vadd.f32 %v1123_v25, %v903_v27  ;;  %v901_v33 = vadd.f32 %v870_v30, %v778_v26 }
  0xeb   : > { %v750_v34 = vpop.f32.mrf.mxu0  ;;  %v1196_v35 = vpop.f32.mrf.mxu1 }
  0xec   : > { %v779_v36 = vadd.f32 %v750_v34, %v514_v29  ;;  %v926_v37 = vmax.f32 %v918_v32, 0.0  ;;  %v916_v38 = vadd.f32 %v1123_v25, %v901_v33  ;;  %v904_v39 = vadd.f32 %v1196_v35, %v781_v31 }
  0xed   : > { %v873_v41 = vpop.f32.mrf.mxu1 }
  0xee   : > { %v934_v42 = vpack.c.bf16 %v926_v37, %v926_v37  ;;  %v924_v43 = vmax.f32 %v916_v38, 0.0  ;;  %v919_v44 = vadd.f32 %v1123_v25, %v904_v39  ;;  %v902_v45 = vadd.f32 %v873_v41, %v779_v36 }
  0xef   : > { %v1187_v47 = vpop.f32.mrf.mxu0 }
  0xf0   : > { %943 = vst.msk [vmem:[%s1423_s26 + $0x8] sm:$0xf] %vm940_vm5, %v934_v42  ;;  %v932_v48 = vpack.c.bf16 %v924_v43, %v924_v43  ;;  %v927_v49 = vmax.f32 %v919_v44, 0.0  ;;  %v917_v50 = vadd.f32 %v1123_v25, %v902_v45  ;;  %v784_v52 = vadd.f32 %v1187_v47, %v535_v40  ;;  %v1199_v53 = vpop.f32.mrf.mxu1 }
  0xf1   : > { %v763_v55 = vpop.f32.mrf.mxu0 }
  0xf2   : > { %941 = vst.msk [vmem:[%s1423_s26] sm:$0xf] %vm940_vm5, %v932_v48  ;;  %v935_v56 = vpack.c.bf16 %v927_v49, %v927_v49  ;;  %v925_v57 = vmax.f32 %v917_v50, 0.0  ;;  %v907_v58 = vadd.f32 %v1199_v53, %v784_v52  ;;  %v782_v59 = vadd.f32 %v763_v55, %v527_v46  ;;  %v886_v60 = vpop.f32.mrf.mxu1 }
  0xf3   : > { %v1188_v62 = vpop.f32.mrf.mxu0 }
  0xf4   : > { %944 = vst.msk [vmem:[%s1423_s26 + $0xc] sm:$0xf] %vm940_vm5, %v935_v56  ;;  %v933_v63 = vpack.c.bf16 %v925_v57, %v925_v57  ;;  %v922_v0 = vadd.f32 %v1123_v25, %v907_v58  ;;  %v905_v1 = vadd.f32 %v886_v60, %v782_v59  ;;  %v785_v2 = vadd.f32 %v1188_v62, %v538_v54  ;;  %v1200_v3 = vpop.f32.mrf.mxu1 }
  0xf5   : > { %v766_v4 = vpop.f32.mrf.mxu0 }
  0xf6   : > { %942 = vst.msk [vmem:[%s1423_s26 + $0x4] sm:$0xf] %vm940_vm5, %v933_v63  ;;  %v930_v5 = vmax.f32 %v922_v0, 0.0  ;;  %v920_v6 = vadd.f32 %v1123_v25, %v905_v1  ;;  %v908_v7 = vadd.f32 %v1200_v3, %v785_v2  ;;  %v783_v8 = vadd.f32 %v766_v4, %v530_v61  ;;  %v889_v9 = vpop.f32.mrf.mxu1 }
  0xf8   : > { %v938_v10 = vpack.c.bf16 %v930_v5, %v930_v5  ;;  %v928_v11 = vmax.f32 %v920_v6, 0.0  ;;  %v923_v12 = vadd.f32 %v1123_v25, %v908_v7  ;;  %v906_v51 = vadd.f32 %v889_v9, %v783_v8 }
  0xfa   : > { %947 = vst.msk [vmem:[%s1423_s26 + $0x18] sm:$0xf] %vm940_vm5, %v938_v10  ;;  %v936_v13 = vpack.c.bf16 %v928_v11, %v928_v11  ;;  %v931_v14 = vmax.f32 %v923_v12, 0.0  ;;  %v921_v15 = vadd.f32 %v1123_v25, %v906_v51 }
  0xfc   : > { %945 = vst.msk [vmem:[%s1423_s26 + $0x10] sm:$0xf] %vm940_vm5, %v936_v13  ;;  %v939_v16 = vpack.c.bf16 %v931_v14, %v931_v14  ;;  %v929_v17 = vmax.f32 %v921_v15, 0.0 }
  0xfe   : > { %948 = vst.msk [vmem:[%s1423_s26 + $0x1c] sm:$0xf] %vm940_vm5, %v939_v16  ;;  %v937_v18 = vpack.c.bf16 %v929_v17, %v929_v17 }
 0x100   : > { %946 = vst.msk [vmem:[%s1423_s26 + $0x14] sm:$0xf] %vm940_vm5, %v937_v18 }
 0x101 PF: > { %s14_s17 = sadd.s32 1, %s1268_s17   ;;  %s1457_s15 = smov %s1264_s16 }
 0x102   : > { %p11_p5 = scmp.ge.s32.totalorder %s14_s17, 4   ;;  %s1458_s16 = smov %s1460_s18 }
 0x104   :  { %13 = sbr.rel (!%p11_p5) target bundleno = 2 (0x2), region = 72 }

// kernel: torchvision_backbone_forward.5
= control target key start
LH: loop header
LB: loop body
LE: loop exit
PB: predicated region body
PF: predicated region fallthrough
CT: control target
= control target key end

     0   :  { %s1744_s15 = smov 0   ;;  %s1746_s16 = smov 0   ;;  %s2043_s0 = inlined_call_operand.vmem [shape: bf16[2,17,17,16], index: 0, kind: input, shape index: {}, may-alias: {0,1}]   ;;  %s2044_s1 = inlined_call_operand.vmem [shape: bf16[2,17,17,16], index: 1, kind: input, shape index: {}, may-alias: {0,1}]   ;;  %s2045_s2 = inlined_call_operand.vmem [shape: bf16[4,16,8], index: 2, kind: input, shape index: {}]   ;;  %s2046_s3 = inlined_call_operand.vmem [shape: f32[1,8], index: 3, kind: input, shape index: {}]   ;;  %s2047_s4 = inlined_call_operand.vmem [shape: bf16[2,16,16,8], index: 4, kind: output, shape index: {}]  }
   0x1   :  { %s1748_s17 = smov 0   ;;  %s1750_s18 = smov 0  }
   0x2   :  { %s1752_s19 = smov 0  }
   0x3 LB: > { %s23_s20 = sadd.s32 1, %s1709_s17  ;;  %s26_s21 = sadd.s32 1, %s1713_s18  ;;  %s1717_s19 = sphi %s1752_s19, %s14_s19   ;;  %s1713_s18 = sphi %s1750_s18, %s2053_s18   ;;  %s1709_s17 = sphi %s1748_s17, %s2052_s17   ;;  %s1705_s16 = sphi %s1746_s16, %s2051_s16   ;;  %s1701_s15 = sphi %s1744_s15, %s2050_s15  }
   0x4   : > { %p24_p0 = scmp.ge.s32.totalorder %s23_s20, 2  ;;  %p1402_p1 = scmp.ge.s32.totalorder %s1717_s19, 1 }
   0x5   : > { %p218_p2 = scmp.lt.s32.totalorder %s1717_s19, 5 }
   0x6   : > { %s2055_s20 = smov (%p24_p0, %s23_s20), 0  ;;  %s2057_s21 = smov (!%p24_p0, %s26_s21), %s1713_s18 }
   0x7   : > { %p219_p3 = pnand %p1402_p1, %p218_p2  ;;  %p28_p4 = scmp.ge.s32.totalorder %s2057_s21, 2 }
   0x8   : > { %s1777_s24 = sshll.u32 (!%p219_p3), %s1701_s15, 3  ;;  %p276_p5 = scmp.lt.s32.totalorder (!%p219_p3), %s1705_s16, 1 }
   0x9   : > { %s2059_s21 = smov (%p28_p4, %s2057_s21), 0  ;;  %222 = sbr.rel (%p219_p3) target bundleno = 290 (0x122), region = 36 }
   0xa   : > { %p278_p6 = scmp.lt.s32.totalorder (!%p219_p3), %s1777_s24, 16  ;;  %s1496_s7 = sadd.s32 (!%p219_p3), 8, %s1777_s24 }
   0xb   : > { %p295_p7 = scmp.lt.s32.totalorder (!%p219_p3), %s1496_s7, 16  ;;  %p307_p8 = scmp.lt.s32.totalorder (!%p219_p3), %s1777_s24, 15 }
   0xe   : > { %v1664_v0 = vld [vmem:[%s2045_s2 + $0x10] sm:$0xff]   ;;  %v1665_v1 = vld [vmem:[%s2045_s2] sm:$0xff]   ;;  %s2061_s16 = smov (!%p276_p5, %s1705_s16), 1  ;;  %v1668_v2 = vld [vmem:[%s2045_s2 + $0x8] sm:$0xff]   ;;  %vm385_vm0 = vcmask 130048   ;;  %s2063_s7 = smov (!%p295_p7, %s1496_s7), 16 }
   0xf   : > { %1549 = vmatprep.subr.bf16.mxu0 %v1664_v0  ;;  %1567 = vmatprep.subr.bf16.mxu1 %v1665_v1  ;;  %s279_s29 = scalar_select %p278_p6, %s1777_s24, 16  ;;  %v1670_v3 = vld [vmem:[%s2045_s2 + $0x18] sm:$0xff]   ;;  %vm642_vm1 = vsmask.f32 3328  ;;  %vm643_vm2 = vsmask.f32 7440 }
  0x10   : > { %1550 = vmatpush3.bf16.msra.mxu0 %v1664_v0  ;;  %1568 = vmatpush3.bf16.msra.mxu1 %v1665_v1  ;;  %s1622_s6 = smul.u32 51, %s2061_s16  ;;  %vm1831_vm3 = vmor %vm642_vm1, %vm643_vm2  ;;  %vm1018_vm4 = vsmask.f32 7424  ;;  %s2065_s24 = smov (!%p307_p8, %s1777_s24), 15  ;;  %vm1259_vm5 = vcmask 60416  }
  0x11   : > { %1585 = vmatprep.subr.bf16.mxu0 %v1668_v2  ;;  %s1621_s8 = smul.u32 3, %s279_s29  ;;  %1603 = vmatprep.subr.bf16.mxu1 %v1670_v3  ;;  %s1408_s27 = sshll.u32 %s2065_s24, 1 }
  0x12   : > { %s1623_s14 = smul.u32 3, %s2063_s7  ;;  %s1409_s28 = sshll.u32 %s2061_s16, 5 }
  0x13   : > { %s282_s9 = sadd.s32 %s1622_s6, %s1621_s8  ;;  %s311_s29 = sadd.s32 %s1409_s28, %s1408_s27 }
  0x14   : > { %s1404_s10 = sshll.u32 %s282_s9, 2  ;;  %s299_s15 = sadd.s32 %s1623_s14, %s1622_s6 }
  0x15   : > { %s1797_s13 = scalar_lea.vmem %s2043_s0, %s1404_s10  ;;  %s1406_s22 = sshll.u32 %s299_s15, 2 }
  0x16   : > { %v1666_v4 = vld [vmem:[%s1797_s13 + $0xc] sm:$0xff]   ;;  %v1667_v5 = vld [vmem:[%s1797_s13] sm:$0xff]   ;;  %v1669_v6 = vld [vmem:[%s1797_s13 + $0x18] sm:$0xff]   ;;  %s1813_s26 = scalar_lea.vmem %s2044_s1, %s1406_s22  ;;  %s1410_s24 = sshll.u32 %s311_s29, 2 }
  0x17   : > { %1551 = vmatprep.mubr.msk.bf16.mxu0 %vm385_vm0, %v1666_v4  ;;  %1569 = vmatprep.mubr.msk.bf16.mxu1 %vm385_vm0, %v1667_v5  ;;  %v1671_v7 = vld [vmem:[%s1797_s13 + $0x24] sm:$0xff]   ;;  %v1672_v8 = vld [vmem:[%s1797_s13 + $0x30] sm:$0xff]   ;;  %v1673_v9 = vld [vmem:[%s1797_s13 + $0x3c] sm:$0xff]   ;;  %s1962_s7 = scalar_lea.vmem %s2047_s4, %s1410_s24 }
  0x18   : > { %1552 = vmatmul.mubr.msk.bf16.vlgmr.msra.gmra.mxu0 %vm385_vm0, %v1669_v6  ;;  %1570 = vmatmul.mubr.msk.bf16.vlgmr.msra.gmra.mxu1 %vm385_vm0, %v1666_v4  ;;  %v618_v10 = vld [vmem:[%s1797_s13] sm:$0xf]  ;;  %v619_v11 = vld [vmem:[%s1797_s13 + $0x4] sm:$0xf]  ;;  %v620_v12 = vld [vmem:[%s1797_s13 + $0x8] sm:$0x1] }
  0x19   : > { %1586 = vmatpush3.bf16.msra.mxu0 %v1668_v2  ;;  %1604 = vmatpush3.bf16.msra.mxu1 %v1670_v3  ;;  %v646_v13 = vshrl.u32 %v618_v10, 16  ;;  %v649_v14 = vshll.u32 %v618_v10, 16  ;;  %v655_v15 = vshll.u32 %v619_v11, 16  ;;  %v659_v16 = vshrl.u32 %v619_v11, 16  ;;  %v621_v17 = vld [vmem:[%s1797_s13 + $0xc] sm:$0xf] }
  0x1a   : > { %1555 = vmatprep.mubr.msk.bf16.mxu0 %vm385_vm0, %v1671_v7  ;;  %1573 = vmatprep.mubr.msk.bf16.mxu1 %vm385_vm0, %v1669_v6  ;;  %v665_v18 = vshll.u32 %v620_v12, 16  ;;  %v622_v19 = vld [vmem:[%s1797_s13 + $0x10] sm:$0xf]  ;;  %v623_v20 = vld [vmem:[%s1797_s13 + $0x14] sm:$0x1]  ;;  %v670_v21 = vshrl.u32 %v621_v17, 16 }
  0x1b   : > { %v648_v22 = vrot.slane %v646_v13, 4  ;;  %v651_v23 = vrot.slane %v649_v14, 5  ;;  %v657_v24 = vrot.slane %v655_v15, 5  ;;  %v661_v25 = vrot.slane %v659_v16, 4  ;;  %v624_v26 = vld [vmem:[%s1797_s13 + $0x18] sm:$0xf] }
  0x1c   : > { %v667_v27 = vrot.slane %v665_v18, 5  ;;  %v672_v28 = vrot.slane %v670_v21, 4  ;;  %v673_v29 = vshll.u32 %v621_v17, 16  ;;  %v679_v30 = vshll.u32 %v622_v19, 16  ;;  %v625_v35 = vld [vmem:[%s1797_s13 + $0x1c] sm:$0xf] }
  0x1d   : > { %v652_v31 = vor.u32 %v651_v23, %v648_v22  ;;  %v662_v32 = vor.u32 %v661_v25, %v657_v24  ;;  %v683_v33 = vshrl.u32 %v622_v19, 16  ;;  %v689_v34 = vshll.u32 %v623_v20, 16  ;;  %v1674_v36 = vld [vmem:[%s1797_s13 + $0x48] sm:$0xff]   ;;  %v626_v46 = vld [vmem:[%s1797_s13 + $0x20] sm:$0x1]  ;;  %v1675_v47 = vld [vmem:[%s1797_s13 + $0x54] sm:$0xff]  }
  0x1e   : > { %v675_v38 = vrot.slane %v673_v29, 5  ;;  %v681_v39 = vrot.slane %v679_v30, 5  ;;  %v694_v40 = vshrl.u32 %v624_v26, 16  ;;  %v697_v41 = vshll.u32 %v624_v26, 16  ;;  %v627_v52 = vld [vmem:[%s1797_s13 + $0x24] sm:$0xf] }
  0x1f   : > { %v653_v42 = vrot.slane %v652_v31, 4  ;;  %v663_v43 = vrot.slane %v662_v32, 4  ;;  %v685_v44 = vrot.slane %v683_v33, 4  ;;  %v691_v45 = vrot.slane %v689_v34, 5  ;;  %v628_v57 = vld [vmem:[%s1797_s13 + $0x28] sm:$0xf] }
  0x20   : > { %1556 = vmatmul.mubr.msk.bf16.gmra.mxu0 %vm385_vm0, %v1672_v8  ;;  %1574 = vmatmul.mubr.msk.bf16.gmra.mxu1 %vm385_vm0, %v1671_v7  ;;  %v676_v48 = vor.u32 %v675_v38, %v672_v28  ;;  %v696_v49 = vrot.slane %v694_v40, 4  ;;  %v699_v50 = vrot.slane %v697_v41, 5  ;;  %v703_v51 = vshll.u32 %v625_v35, 16  ;;  %v629_v1 = vld [vmem:[%s1797_s13 + $0x2c] sm:$0x1] }
  0x21   : > { %1559 = vmatprep.mubr.msk.bf16.mxu0 %vm385_vm0, %v1673_v9  ;;  %1577 = vmatprep.mubr.msk.bf16.mxu1 %vm385_vm0, %v1672_v8  ;;  %v658_v53 = vsel %vm1831_vm3, %v653_v42, %v657_v24  ;;  %v668_v54 = vsel %vm1831_vm3, %v663_v43, %v667_v27  ;;  %v686_v55 = vor.u32 %v685_v44, %v681_v39  ;;  %v707_v56 = vshrl.u32 %v625_v35, 16  ;;  %v630_v7 = vld [vmem:[%s1797_s13 + $0x30] sm:$0xf]  ;;  %v1676_v8 = vld [vmem:[%s1813_s26] sm:$0xff]   ;;  %v631_v13 = vld [vmem:[%s1797_s13 + $0x34] sm:$0xf] }
  0x22   : > { %v1442_v58 = vcombine.low %v658_v53, %v668_v54  ;;  %v677_v59 = vrot.slane %v676_v48, 4  ;;  %v700_v60 = vor.u32 %v699_v50, %v696_v49  ;;  %v705_v61 = vrot.slane %v703_v51, 5  ;;  %v632_v18 = vld [vmem:[%s1797_s13 + $0x38] sm:$0x1]  ;;  %v633_v19 = vld [vmem:[%s1797_s13 + $0x3c] sm:$0xf] }
  0x23   : > { %v687_v62 = vrot.slane %v686_v55, 4  ;;  %v709_v63 = vrot.slane %v707_v56, 4  ;;  %v713_v0 = vshll.u32 %v626_v46, 16  ;;  %v718_v2 = vshrl.u32 %v627_v52, 16  ;;  %v634_v24 = vld [vmem:[%s1797_s13 + $0x40] sm:$0xf] }
  0x24   : > { %v682_v3 = vsel %vm1831_vm3, %v677_v59, %v681_v39  ;;  %v701_v4 = vrot.slane %v700_v60, 4  ;;  %v721_v5 = vshll.u32 %v627_v52, 16  ;;  %v727_v6 = vshll.u32 %v628_v57, 16  ;;  %v635_v44 = vld [vmem:[%s1797_s13 + $0x44] sm:$0x1] }
  0x25   : > { %v710_v10 = vor.u32 %v709_v63, %v705_v61  ;;  %v715_v11 = vrot.slane %v713_v0, 5  ;;  %v720_v12 = vrot.slane %v718_v2, 4  ;;  %v731_v21 = vshrl.u32 %v628_v57, 16  ;;  %v636_v48 = vld [vmem:[%s1797_s13 + $0x48] sm:$0xf] }
  0x26   : > { %v706_v15 = vsel %vm1831_vm3, %v701_v4, %v705_v61  ;;  %v723_v16 = vrot.slane %v721_v5, 5  ;;  %v729_v17 = vrot.slane %v727_v6, 5  ;;  %v737_v22 = vshll.u32 %v629_v1, 16  ;;  %v637_v59 = vld [vmem:[%s1797_s13 + $0x4c] sm:$0xf] }
  0x27   : > { %v711_v20 = vrot.slane %v710_v10, 4  ;;  %v742_v23 = vshrl.u32 %v630_v7, 16  ;;  %v745_v26 = vshll.u32 %v630_v7, 16  ;;  %v751_v27 = vshll.u32 %v631_v13, 16  ;;  %v638_v0 = vld [vmem:[%s1797_s13 + $0x50] sm:$0x1] }
  0x28   : > { %1560 = vmatmul.mubr.msk.bf16.gmra.mxu0 %vm385_vm0, %v1674_v36  ;;  %1578 = vmatmul.mubr.msk.bf16.gmra.mxu1 %vm385_vm0, %v1673_v9  ;;  %v692_v9 = vsel %vm1831_vm3, %v687_v62, %v691_v45  ;;  %v724_v25 = vor.u32 %v723_v16, %v720_v12  ;;  %v755_v28 = vshrl.u32 %v631_v13, 16  ;;  %v733_v30 = vrot.slane %v731_v21, 4  ;;  %v639_v1 = vld [vmem:[%s1797_s13 + $0x54] sm:$0xf]  ;;  %v640_v13 = vld [vmem:[%s1797_s13 + $0x58] sm:$0xf] }
  0x29   : > { %1563 = vmatprep.mubr.msk.bf16.mxu0 %vm385_vm0, %v1675_v47  ;;  %1581 = vmatprep.mubr.msk.bf16.mxu1 %vm385_vm0, %v1674_v36  ;;  %v1855_v14 = vcombine.low %v682_v3, %v692_v9  ;;  %v716_v29 = vsel %vm1831_vm3, %v711_v20, %v715_v11  ;;  %v739_v31 = vrot.slane %v737_v22, 5  ;;  %v744_v32 = vrot.slane %v742_v23, 4 }
  0x2a   : > { %v1444_v33 = vcombine.low %v706_v15, %v716_v29  ;;  %v725_v34 = vrot.slane %v724_v25, 4  ;;  %v747_v35 = vrot.slane %v745_v26, 5  ;;  %v753_v36 = vrot.slane %v751_v27, 5 }
  0x2b   : > { %v734_v38 = vor.u32 %v733_v30, %v729_v17  ;;  %v757_v39 = vrot.slane %v755_v28, 4  ;;  %v761_v40 = vshll.u32 %v632_v18, 16  ;;  %v766_v41 = vshrl.u32 %v633_v19, 16 }
  0x2c   : > { %v730_v42 = vsel %vm1831_vm3, %v725_v34, %v729_v17  ;;  %v748_v43 = vor.u32 %v747_v35, %v744_v32  ;;  %v769_v45 = vshll.u32 %v633_v19, 16  ;;  %v775_v46 = vshll.u32 %v634_v24, 16  ;;  %v641_v19 = vld [vmem:[%s1797_s13 + $0x5c] sm:$0x1] }
  0x2d   : > { %v735_v49 = vrot.slane %v734_v38, 4  ;;  %v763_v50 = vrot.slane %v761_v40, 5  ;;  %v768_v51 = vrot.slane %v766_v41, 4  ;;  %v779_v55 = vshrl.u32 %v634_v24, 16 }
  0x2e   : > { %v749_v52 = vrot.slane %v748_v43, 4  ;;  %v771_v53 = vrot.slane %v769_v45, 5  ;;  %v777_v54 = vrot.slane %v775_v46, 5  ;;  %v790_v60 = vshrl.u32 %v636_v48, 16 }
  0x2f   : > { %v740_v56 = vsel %vm1831_vm3, %v735_v49, %v739_v31  ;;  %v781_v63 = vrot.slane %v779_v55, 4  ;;  %v793_v5 = vshll.u32 %v636_v48, 16  ;;  %v799_v9 = vshll.u32 %v637_v59, 16  ;;  %v1678_v45 = vld [vmem:[%s1813_s26 + $0x8] ss:$0 sps:$4 sm:$0x11]  }
  0x30   : > { %1564 = vmatmul.mubr.msk.bf16.gmra.mxu0 %vm385_vm0, %v1676_v8  ;;  %1582 = vmatmul.mubr.msk.bf16.gmra.mxu1 %vm385_vm0, %v1675_v47  ;;  %v758_v47 = vor.u32 %v757_v39, %v753_v36  ;;  %v1445_v61 = vcombine.low %v730_v42, %v740_v56  ;;  %v772_v62 = vor.u32 %v771_v53, %v768_v51  ;;  %v792_v4 = vrot.slane %v790_v60, 4 }
  0x31   : > { %1587 = vmatprep.mubr.msk.bf16.mxu0 %vm385_vm0, %v1442_v58  ;;  %1605 = vmatprep.mubr.msk.bf16.mxu1 %vm385_vm0, %v1855_v14  ;;  %v785_v58 = vshll.u32 %v635_v44, 16  ;;  %v754_v2 = vsel %vm1831_vm3, %v749_v52, %v753_v36  ;;  %v782_v7 = vor.u32 %v781_v63, %v777_v54  ;;  %v795_v10 = vrot.slane %v793_v5, 5  ;;  %v1677_v36 = vld [vmem:[%s1813_s26] sm:$0xff]  }
  0x32   : > { %v759_v57 = vrot.slane %v758_v47, 4  ;;  %v773_v6 = vrot.slane %v772_v62, 4  ;;  %v803_v11 = vshrl.u32 %v637_v59, 16  ;;  %v809_v12 = vshll.u32 %v638_v0, 16 }
  0x33   : > { %v787_v8 = vrot.slane %v785_v58, 5  ;;  %v814_v15 = vshrl.u32 %v639_v1, 16  ;;  %v783_v17 = vrot.slane %v782_v7, 4  ;;  %v801_v18 = vrot.slane %v799_v9, 5 }
  0x34   : > { %v764_v3 = vsel %vm1831_vm3, %v759_v57, %v763_v50  ;;  %v778_v16 = vsel %vm1831_vm3, %v773_v6, %v777_v54  ;;  %v817_v20 = vshll.u32 %v639_v1, 16  ;;  %v805_v22 = vrot.slane %v803_v11, 4 }
  0x35   : > { %v1446_v21 = vcombine.low %v754_v2, %v764_v3  ;;  %v816_v23 = vrot.slane %v814_v15, 4  ;;  %v788_v24 = vsel %vm1831_vm3, %v783_v17, %v787_v8  ;;  %v823_v26 = vshll.u32 %v640_v13, 16 }
  0x36   : > { %v819_v25 = vrot.slane %v817_v20, 5  ;;  %v827_v27 = vshrl.u32 %v640_v13, 16  ;;  %v1447_v28 = vcombine.low %v778_v16, %v788_v24  ;;  %v806_v29 = vor.u32 %v805_v22, %v801_v18 }
  0x37   : > { %v811_v30 = vrot.slane %v809_v12, 5  ;;  %v833_v31 = vshll.u32 %v641_v19, 16  ;;  %v825_v34 = vrot.slane %v823_v26, 5  ;;  %v1022_v46 = vshll.u32 %v1677_v36, 16 }
  0x38   : > { %1588 = vmatmul.mubr.msk.bf16.vlgmr.msra.gmra.mxu0 %vm385_vm0, %v1855_v14  ;;  %1606 = vmatmul.mubr.msk.bf16.vlgmr.msra.gmra.mxu1 %vm385_vm0, %v1444_v33  ;;  %v796_v14 = vor.u32 %v795_v10, %v792_v4  ;;  %v829_v35 = vrot.slane %v827_v27, 4  ;;  %v807_v38 = vrot.slane %v806_v29, 4  ;;  %v1020_v51 = vshrl.u32 %v1677_v36, 16  ;;  %v1955_v29 = vld [vmem:[%s2046_s3] ss:$0 sm:$0xff] }
  0x39   : > { %1591 = vmatprep.mubr.msk.bf16.mxu0 %vm385_vm0, %v1444_v33  ;;  %1609 = vmatprep.mubr.msk.bf16.mxu1 %vm385_vm0, %v1445_v61  ;;  %v820_v33 = vor.u32 %v819_v25, %v816_v23  ;;  %v835_v41 = vrot.slane %v833_v31, 5  ;;  %v1024_v52 = vrot.slane %v1022_v46, 1  ;;  %v1027_v53 = vshll.u32 %v1678_v45, 16 }
  0x3a   : > { %v797_v32 = vrot.slane %v796_v14, 4  ;;  %v830_v40 = vor.u32 %v829_v35, %v825_v34  ;;  %v812_v43 = vsel %vm1831_vm3, %v807_v38, %v811_v30 }
  0x3b   : > { %v821_v39 = vrot.slane %v820_v33, 4  ;;  %v1025_v54 = vor.u32 %v1024_v52, %v1020_v51  ;;  %v1029_v55 = vrot.slane %v1027_v53, 1 }
  0x3c   : > { %v802_v42 = vsel %vm1831_vm3, %v797_v32, %v801_v18  ;;  %v831_v44 = vrot.slane %v830_v40, 4 }
  0x3d   : > { %v826_v48 = vsel %vm1831_vm3, %v821_v39, %v825_v34  ;;  %v1448_v47 = vcombine.low %v802_v42, %v812_v43  ;;  %v1030_v56 = vsel %vm1018_vm4, %v1025_v54, %v1029_v55 }
  0x3e   : > { %v836_v49 = vsel %vm1831_vm3, %v831_v44, %v835_v41 }
  0x3f   : > { %v1449_v50 = vcombine.low %v826_v48, %v836_v49 }
  0x40   : > { %1592 = vmatmul.mubr.msk.bf16.gmra.mxu0 %vm385_vm0, %v1445_v61  ;;  %1610 = vmatmul.mubr.msk.bf16.gmra.mxu1 %vm385_vm0, %v1446_v21 }
  0x41   : > { %1595 = vmatprep.mubr.msk.bf16.mxu0 %vm385_vm0, %v1446_v21  ;;  %1613 = vmatprep.mubr.msk.bf16.mxu1 %vm385_vm0, %v1447_v28 }
  0x48   : > { %1596 = vmatmul.mubr.msk.bf16.gmra.mxu0 %vm385_vm0, %v1447_v28  ;;  %1614 = vmatmul.mubr.msk.bf16.gmra.mxu1 %vm385_vm0, %v1448_v47 }
  0x49   : > { %1599 = vmatprep.mubr.msk.bf16.mxu0 %vm385_vm0, %v1448_v47  ;;  %1617 = vmatprep.mubr.msk.bf16.mxu1 %vm385_vm0, %v1449_v50 }
  0x50   : > { %1600 = vmatmul.mubr.msk.bf16.gmra.mxu0 %vm385_vm0, %v1449_v50  ;;  %1618 = vmatmul.mubr.msk.bf16.gmra.mxu1 %vm385_vm0, %v1030_v56 }
  0xd8   : > { %v1553_v37 = vpop.f32.mrf.mxu0  ;;  %v1571_v57 = vpop.f32.mrf.mxu1 }
  0xd9   : > { %v564_v24 = vadd.f32 %v1571_v57, %v1553_v37 }
  0xda   : > { %v444_v58 = vpop.f32.mrf.mxu0  ;;  %v555_v59 = vpop.f32.mrf.mxu1 }
  0xdb   : > { %v556_v27 = vadd.f32 %v555_v59, %v444_v58 }
  0xdc   : > { %v1554_v60 = vpop.f32.mrf.mxu0  ;;  %v1572_v61 = vpop.f32.mrf.mxu1 }
  0xdd   : > { %v567_v32 = vadd.f32 %v1572_v61, %v1554_v60 }
  0xde   : > { %v447_v62 = vpop.f32.mrf.mxu0  ;;  %v558_v63 = vpop.f32.mrf.mxu1 }
  0xdf   : > { %v559_v38 = vadd.f32 %v558_v63, %v447_v62 }
  0xe0   : > { %v1557_v0 = vpop.f32.mrf.mxu0  ;;  %v1575_v1 = vpop.f32.mrf.mxu1 }
  0xe1   : > { %v580_v49 = vadd.f32 %v1575_v1, %v1557_v0 }
  0xe2   : > { %v460_v2 = vpop.f32.mrf.mxu0  ;;  %v571_v3 = vpop.f32.mrf.mxu1 }
  0xe3   : > { %v572_v47 = vadd.f32 %v571_v3, %v460_v2 }
  0xe4   : > { %v1558_v4 = vpop.f32.mrf.mxu0  ;;  %v1576_v5 = vpop.f32.mrf.mxu1 }
  0xe5   : > { %v583_v56 = vadd.f32 %v1576_v5, %v1558_v4 }
  0xe6   : > { %v1913_v6 = vpop.f32.mrf.mxu0  ;;  %v1915_v7 = vpop.f32.mrf.mxu1 }
  0xe7   : > { %v575_v63 = vadd.f32 %v1915_v7, %v1913_v6 }
  0xe8   : > { %v1917_v8 = vpop.f32.mrf.mxu0  ;;  %v1919_v9 = vpop.f32.mrf.mxu1 }
  0xea   : > { %v1921_v10 = vpop.f32.mrf.mxu0  ;;  %v1923_v11 = vpop.f32.mrf.mxu1 }
  0xec   : > { %v1925_v12 = vpop.f32.mrf.mxu0  ;;  %v1927_v13 = vpop.f32.mrf.mxu1 }
  0xee   : > { %v1929_v15 = vpop.f32.mrf.mxu0  ;;  %v1931_v16 = vpop.f32.mrf.mxu1 }
  0xf0   : > { %v1934_v17 = vpop.f32.mrf.mxu0  ;;  %v1936_v18 = vpop.f32.mrf.mxu1 }
  0xf2   : > { %v1938_v19 = vpop.f32.mrf.mxu0  ;;  %v1940_v20 = vpop.f32.mrf.mxu1 }
  0xf4   : > { %v1943_v21 = vpop.f32.mrf.mxu0  ;;  %v1945_v14 = vpop.f32.mrf.mxu1 }
  0xf6   : > { %v1947_v22 = vpop.f32.mrf.mxu0  ;;  %v1949_v23 = vpop.f32.mrf.mxu1 }
  0xf8   : > { %v1589_v25 = vpop.f32.mrf.mxu0  ;;  %v1607_v26 = vpop.f32.mrf.mxu1 }
  0xf9   : > { %v993_v28 = vadd.f32 %v1589_v25, %v564_v24  ;;  %v596_v25 = vadd.f32 %v1919_v9, %v1917_v8 }
  0xfa   : > { %v928_v30 = vpop.f32.mrf.mxu0  ;;  %v1077_v31 = vpop.f32.mrf.mxu1 }
  0xfb   : > { %v1142_v33 = vadd.f32 %v1607_v26, %v993_v28  ;;  %v991_v34 = vadd.f32 %v928_v30, %v556_v27 }
  0xfc   : > { %v1590_v35 = vpop.f32.mrf.mxu0  ;;  %v1608_v36 = vpop.f32.mrf.mxu1 }
  0xfd   : > { %v1165_v39 = vadd.f32 %v1955_v29, %v1142_v33  ;;  %v1140_v40 = vadd.f32 %v1077_v31, %v991_v34  ;;  %v994_v41 = vadd.f32 %v1590_v35, %v567_v32 }
  0xfe   : > { %v931_v42 = vpop.f32.mrf.mxu0  ;;  %v1080_v43 = vpop.f32.mrf.mxu1 }
  0xff   : > { %v1181_v44 = vmax.f32 %v1165_v39, 0.0  ;;  %v1163_v45 = vadd.f32 %v1955_v29, %v1140_v40  ;;  %v1143_v46 = vadd.f32 %v1608_v36, %v994_v41  ;;  %v992_v48 = vadd.f32 %v931_v42, %v559_v38 }
 0x100   : > { %v1593_v50 = vpop.f32.mrf.mxu0  ;;  %v1611_v51 = vpop.f32.mrf.mxu1  ;;  %v588_v38 = vadd.f32 %v1923_v11, %v1921_v10  ;;  %v599_v39 = vadd.f32 %v1927_v13, %v1925_v12 }
 0x101   : > { %v1499_v52 = vpack.c.bf16 %v1181_v44, %v1181_v44  ;;  %v1179_v53 = vmax.f32 %v1163_v45, 0.0  ;;  %v1166_v54 = vadd.f32 %v1955_v29, %v1143_v46  ;;  %v1141_v55 = vadd.f32 %v1080_v43, %v992_v48 }
 0x102   : > { %v997_v37 = vadd.f32 %v1593_v50, %v580_v49  ;;  %v944_v57 = vpop.f32.mrf.mxu0  ;;  %v1093_v58 = vpop.f32.mrf.mxu1  ;;  %v591_v48 = vadd.f32 %v1931_v16, %v1929_v15 }
 0x103   : > { %1262 = vst.msk [vmem:[%s1962_s7 + $0x8] sm:$0xf] %vm1259_vm5, %v1499_v52  ;;  %v1497_v59 = vpack.c.bf16 %v1179_v53, %v1179_v53  ;;  %v1182_v60 = vmax.f32 %v1166_v54, 0.0  ;;  %v1164_v61 = vadd.f32 %v1955_v29, %v1141_v55  ;;  %v995_v62 = vadd.f32 %v944_v57, %v572_v47 }
 0x104   : > { %v1146_v0 = vadd.f32 %v1611_v51, %v997_v37  ;;  %v1594_v1 = vpop.f32.mrf.mxu0  ;;  %v1612_v2 = vpop.f32.mrf.mxu1  ;;  %v612_v51 = vadd.f32 %v1936_v18, %v1934_v17  ;;  %v604_v37 = vadd.f32 %v1940_v20, %v1938_v19 }
 0x105   : > { %1260 = vst.msk [vmem:[%s1962_s7] sm:$0xf] %vm1259_vm5, %v1497_v59  ;;  %v1500_v3 = vpack.c.bf16 %v1182_v60, %v1182_v60  ;;  %v1180_v4 = vmax.f32 %v1164_v61, 0.0  ;;  %v1144_v5 = vadd.f32 %v1093_v58, %v995_v62  ;;  %v998_v24 = vadd.f32 %v1594_v1, %v583_v56 }
 0x106   : > { %v1169_v26 = vadd.f32 %v1955_v29, %v1146_v0  ;;  %v947_v27 = vpop.f32.mrf.mxu0  ;;  %v1096_v28 = vpop.f32.mrf.mxu1 }
 0x107   : > { %1263 = vst.msk [vmem:[%s1962_s7 + $0xc] sm:$0xf] %vm1259_vm5, %v1500_v3  ;;  %v1498_v6 = vpack.c.bf16 %v1180_v4, %v1180_v4  ;;  %v1167_v7 = vadd.f32 %v1955_v29, %v1144_v5  ;;  %v1147_v30 = vadd.f32 %v1612_v2, %v998_v24  ;;  %v996_v31 = vadd.f32 %v947_v27, %v575_v63 }
 0x108   : > { %v1185_v32 = vmax.f32 %v1169_v26, 0.0  ;;  %v1597_v33 = vpop.f32.mrf.mxu0  ;;  %v1615_v34 = vpop.f32.mrf.mxu1  ;;  %v615_v3 = vadd.f32 %v1945_v14, %v1943_v21  ;;  %v607_v4 = vadd.f32 %v1949_v23, %v1947_v22 }
 0x109   : > { %1261 = vst.msk [vmem:[%s1962_s7 + $0x4] sm:$0xf] %vm1259_vm5, %v1498_v6  ;;  %v1183_v35 = vmax.f32 %v1167_v7, 0.0  ;;  %v1170_v8 = vadd.f32 %v1955_v29, %v1147_v30  ;;  %v1145_v9 = vadd.f32 %v1096_v28, %v996_v31  ;;  %v1001_v36 = vadd.f32 %v1597_v33, %v596_v25 }
 0x10a   : > { %v1503_v40 = vpack.c.bf16 %v1185_v32, %v1185_v32  ;;  %v960_v41 = vpop.f32.mrf.mxu0  ;;  %v1109_v42 = vpop.f32.mrf.mxu1 }
 0x10b   : > { %v1501_v43 = vpack.c.bf16 %v1183_v35, %v1183_v35  ;;  %v1186_v44 = vmax.f32 %v1170_v8, 0.0  ;;  %v1168_v45 = vadd.f32 %v1955_v29, %v1145_v9  ;;  %v1150_v46 = vadd.f32 %v1615_v34, %v1001_v36 }
 0x10c   : > { %1266 = vst.msk [vmem:[%s1962_s7 + $0x18] sm:$0xf] %vm1259_vm5, %v1503_v40  ;;  %v999_v49 = vadd.f32 %v960_v41, %v588_v38  ;;  %v1598_v47 = vpop.f32.mrf.mxu0  ;;  %v1616_v10 = vpop.f32.mrf.mxu1 }
 0x10d   : > { %1264 = vst.msk [vmem:[%s1962_s7 + $0x10] sm:$0xf] %vm1259_vm5, %v1501_v43  ;;  %v1504_v11 = vpack.c.bf16 %v1186_v44, %v1186_v44  ;;  %v1184_v12 = vmax.f32 %v1168_v45, 0.0  ;;  %v1173_v13 = vadd.f32 %v1955_v29, %v1150_v46  ;;  %v1002_v50 = vadd.f32 %v1598_v47, %v599_v39 }
 0x10e   : > { %v1148_v52 = vadd.f32 %v1109_v42, %v999_v49  ;;  %v963_v53 = vpop.f32.mrf.mxu0  ;;  %v1112_v54 = vpop.f32.mrf.mxu1 }
 0x10f   : > { %1267 = vst.msk [vmem:[%s1962_s7 + $0x1c] sm:$0xf] %vm1259_vm5, %v1504_v11  ;;  %v1502_v15 = vpack.c.bf16 %v1184_v12, %v1184_v12  ;;  %v1189_v16 = vmax.f32 %v1173_v13, 0.0  ;;  %v1151_v55 = vadd.f32 %v1616_v10, %v1002_v50  ;;  %v1000_v56 = vadd.f32 %v963_v53, %v591_v48 }
 0x110   : > { %v1171_v57 = vadd.f32 %v1955_v29, %v1148_v52  ;;  %v1601_v58 = vpop.f32.mrf.mxu0  ;;  %v1619_v59 = vpop.f32.mrf.mxu1 }
 0x111   : > { %1265 = vst.msk [vmem:[%s1962_s7 + $0x14] sm:$0xf] %vm1259_vm5, %v1502_v15  ;;  %v1507_v17 = vpack.c.bf16 %v1189_v16, %v1189_v16  ;;  %v1174_v18 = vadd.f32 %v1955_v29, %v1151_v55  ;;  %v1149_v60 = vadd.f32 %v1112_v54, %v1000_v56  ;;  %v1005_v61 = vadd.f32 %v1601_v58, %v612_v51 }
 0x112   : > { %v1187_v62 = vmax.f32 %v1171_v57, 0.0  ;;  %v976_v63 = vpop.f32.mrf.mxu0  ;;  %v1125_v0 = vpop.f32.mrf.mxu1 }
 0x113   : > { %1270 = vst.msk [vmem:[%s1962_s7 + $0x28] sm:$0xf] %vm1259_vm5, %v1507_v17  ;;  %v1190_v1 = vmax.f32 %v1174_v18, 0.0  ;;  %v1172_v19 = vadd.f32 %v1955_v29, %v1149_v60  ;;  %v1154_v20 = vadd.f32 %v1619_v59, %v1005_v61  ;;  %v1003_v2 = vadd.f32 %v976_v63, %v604_v37 }
 0x114   : > { %v1505_v5 = vpack.c.bf16 %v1187_v62, %v1187_v62  ;;  %v1602_v24 = vpop.f32.mrf.mxu0  ;;  %v1620_v25 = vpop.f32.mrf.mxu1 }
 0x115   : > { %v1508_v26 = vpack.c.bf16 %v1190_v1, %v1190_v1  ;;  %v1188_v27 = vmax.f32 %v1172_v19, 0.0  ;;  %v1177_v28 = vadd.f32 %v1955_v29, %v1154_v20  ;;  %v1152_v6 = vadd.f32 %v1125_v0, %v1003_v2 }
 0x116   : > { %1268 = vst.msk [vmem:[%s1962_s7 + $0x20] sm:$0xf] %vm1259_vm5, %v1505_v5  ;;  %v1006_v7 = vadd.f32 %v1602_v24, %v615_v3  ;;  %v979_v30 = vpop.f32.mrf.mxu0  ;;  %v1128_v32 = vpop.f32.mrf.mxu1 }
 0x117   : > { %1271 = vst.msk [vmem:[%s1962_s7 + $0x2c] sm:$0xf] %vm1259_vm5, %v1508_v26  ;;  %v1506_v21 = vpack.c.bf16 %v1188_v27, %v1188_v27  ;;  %v1193_v14 = vmax.f32 %v1177_v28, 0.0  ;;  %v1175_v22 = vadd.f32 %v1955_v29, %v1152_v6  ;;  %v1004_v23 = vadd.f32 %v979_v30, %v607_v4 }
 0x118   : > { %v1155_v31 = vadd.f32 %v1620_v25, %v1006_v7 }
 0x119   : > { %1269 = vst.msk [vmem:[%s1962_s7 + $0x24] sm:$0xf] %vm1259_vm5, %v1506_v21  ;;  %v1511_v33 = vpack.c.bf16 %v1193_v14, %v1193_v14  ;;  %v1191_v34 = vmax.f32 %v1175_v22, 0.0  ;;  %v1153_v35 = vadd.f32 %v1128_v32, %v1004_v23 }
 0x11a   : > { %v1178_v8 = vadd.f32 %v1955_v29, %v1155_v31 }
 0x11b   : > { %1274 = vst.msk [vmem:[%s1962_s7 + $0x38] sm:$0xf] %vm1259_vm5, %v1511_v33  ;;  %v1509_v9 = vpack.c.bf16 %v1191_v34, %v1191_v34  ;;  %v1176_v36 = vadd.f32 %v1955_v29, %v1153_v35 }
 0x11c   : > { %v1194_v38 = vmax.f32 %v1178_v8, 0.0 }
 0x11d   : > { %1272 = vst.msk [vmem:[%s1962_s7 + $0x30] sm:$0xf] %vm1259_vm5, %v1509_v9  ;;  %v1192_v39 = vmax.f32 %v1176_v36, 0.0 }
 0x11e   : > { %v1512_v40 = vpack.c.bf16 %v1194_v38, %v1194_v38 }
 0x11f   : > { %v1510_v41 = vpack.c.bf16 %v1192_v39, %v1192_v39 }
 0x120   : > { %1275 = vst.msk [vmem:[%s1962_s7 + $0x3c] sm:$0xf] %vm1259_vm5, %v1512_v40 }
 0x121   : > { %1273 = vst.msk [vmem:[%s1962_s7 + $0x34] sm:$0xf] %vm1259_vm5, %v1510_v41 }
 0x122 PF: > { %s14_s19 = sadd.s32 1, %s1717_s19   ;;  %s2050_s15 = smov %s1709_s17 }
 0x123   : > { %p11_p9 = scmp.ge.s32.totalorder %s14_s19, 6   ;;  %s2051_s16 = smov %s1713_s18 }
 0x124   : > { %s2052_s17 = smov %s2055_s20  ;;  %s2053_s18 = smov %s2059_s21 }
 0x125   :  { %13 = sbr.rel (!%p11_p9) target bundleno = 3 (0x3), region = 72 }

// kernel: torchvision_backbone_forward.7
= control target key start
LH: loop header
LB: loop body
LE: loop exit
PB: predicated region body
PF: predicated region fallthrough
CT: control target
= control target key end

     0   :  { %s1181_s15 = smov 0   ;;  %s1183_s16 = smov 0   ;;  %s1354_s0 = inlined_call_operand.vmem [shape: bf16[2,5,5,64], index: 0, kind: input, shape index: {}, may-alias: {0,1}]   ;;  %s1355_s1 = inlined_call_operand.vmem [shape: bf16[2,5,5,64], index: 1, kind: input, shape index: {}, may-alias: {0,1}]   ;;  %s1356_s2 = inlined_call_operand.vmem [shape: bf16[4,64,32], index: 2, kind: input, shape index: {}]   ;;  %s1357_s3 = inlined_call_operand.vmem [shape: f32[1,32], index: 3, kind: input, shape index: {}]   ;;  %s1358_s4 = inlined_call_operand.vmem [shape: bf16[2,4,4,32], index: 4, kind: output, shape index: {}]  }
   0x1   :  { %s1185_s17 = smov 0  }
   0x2 LB: > { %s26_s18 = sadd.s32 1, %s1147_s16  ;;  %p949_p0 = scmp.ge.s32.totalorder %s1151_s17, 1  ;;  %s1151_s17 = sphi %s1185_s17, %s14_s17   ;;  %s1147_s16 = sphi %s1183_s16, %s1366_s16   ;;  %s1143_s15 = sphi %s1181_s15, %s1365_s15  }
   0x3   : > { %p28_p1 = scmp.ge.s32.totalorder %s26_s18, 2  ;;  %p214_p2 = scmp.lt.s32.totalorder %s1151_s17, 3 }
   0x5   : > { %s1368_s18 = smov (%p28_p1, %s26_s18), 0  ;;  %p215_p3 = pnand %p949_p0, %p214_p2 }
   0x6   : > { %p267_p4 = scmp.lt.s32.totalorder (!%p215_p3), %s1143_s15, 1 }
   0x7   : > { %218 = sbr.rel (%p215_p3) target bundleno = 255 (0xff), region = 36 }
   0xc   : > { %v1108_v0 = vld [vmem:[%s1356_s2 + $0x58] sm:$0xff]   ;;  %v1153_v1 = vmov 0.0   ;;  %v1110_v3 = vld [vmem:[%s1356_s2 + $0x50] sm:$0xff]   ;;  %vm1154_vm0 = vmmov 0   ;;  %s1370_s15 = smov (!%p267_p4, %s1143_s15), 1  ;;  %v323_v5 = vlaneseq  ;;  %v1112_v6 = vld [vmem:[%s1356_s2 + $0x48] sm:$0xff]  }
   0xd   : > { %1030 = vmatprep.subr.bf16.mxu0 %v1153_v1  ;;  %1042 = vmatprep.subr.bf16.mxu1 %v1153_v1  ;;  %v1109_v2 = vld [vmem:[%s1356_s2 + $0x18] sm:$0xff]   ;;  %v1111_v4 = vld [vmem:[%s1356_s2 + $0x10] sm:$0xff]   ;;  %s1078_s29 = smul.u32 20, %s1370_s15  ;;  %v1113_v7 = vld [vmem:[%s1356_s2 + $0x8] sm:$0xff]   ;;  %v1155_v12 = vmov 1983009808  }
   0xe   : > { %1031 = vmatpush3.bf16.msra.mxu0 %v1108_v0  ;;  %1038 = vmatprep.mubr.msk.bf16.mxu0 %vm1154_vm0, %v1153_v1  ;;  %v324_v8 = vshrl.u32 %v323_v5, 7  ;;  %v321_v13 = vunpack.c.l.s4 %v1155_v12  ;;  %v1114_v14 = vld [vmem:[%s1356_s2 + $0x40] sm:$0xff]   ;;  %vm339_vm1 = vcmask 1045504   ;;  %vm376_vm2 = vcmask 523264   ;;  %v1122_v29 = vld [vmem:[%s1356_s2 + $0x78] sm:$0xff]   ;;  %v1123_v34 = vld [vmem:[%s1356_s2 + $0x30] sm:$0xff]  }
   0xf   : > { %1043 = vmatpush3.bf16.msra.mxu1 %v1109_v2  ;;  %1032 = vmatprep.subr.bf16.mxu0 %v1153_v1  ;;  %s1233_s8 = scalar_lea.vmem %s1354_s0, %s1078_s29  ;;  %s1008_s9 = sadd.s32 16, %s1078_s29  ;;  %v1115_v16 = vld [vmem:[%s1356_s2] sm:$0xff]   ;;  %v1121_v32 = vld [vmem:[%s1356_s2 + $0x38] sm:$0xff]   ;;  %v1124_v35 = vld [vmem:[%s1356_s2 + $0x70] sm:$0xff]   ;;  %vm546_vm3 = vsmask.f32 1280 }
  0x10   : > { %1044 = vmatprep.subr.bf16.mxu1 %v1153_v1  ;;  %1050 = vmatprep.mubr.msk.bf16.mxu1 %vm1154_vm0, %v1153_v1  ;;  %s289_s12 = scalar_lea.vmem %s1355_s1, %s1008_s9  ;;  %v304_v9 = vld [vmem:[%s1233_s8 + $0x4] sm:$0x3]  ;;  %v305_v10 = vld [vmem:[%s1233_s8 + $0x8] sm:$0x3]  ;;  %v306_v11 = vld [vmem:[%s1233_s8 + $0xc] sm:$0x3]  ;;  %v322_v18 = vunpack.c.0.s8 %v321_v13 }
  0x11   : > { %v1117_v15 = vld [vmem:[%s289_s12] ss:$0 sps:$4 sm:$0x33]   ;;  %v319_v17 = vcombine.low %v304_v9, %v305_v10  ;;  %v422_v19 = vcombine.low %v305_v10, %v306_v11  ;;  %vm547_vm4 = vsmask.f32 3336  ;;  %v1126_v48 = vld [vmem:[%s1356_s2 + $0x68] sm:$0xff]  }
  0x12   : > { %1033 = vmatpush3.bf16.msra.mxu0 %v1110_v3  ;;  %v338_v20 = vrot.slane %v1117_v15, 2  ;;  %v303_v21 = vld [vmem:[%s1233_s8] sm:$0x3]  ;;  %v1250_v22 = vsub.s32 %v322_v18, %v324_v8  ;;  %vm1284_vm5 = vmor %vm546_vm3, %vm547_vm4  ;;  %vm549_vm6 = vsmask.f32 5392  ;;  %v1125_v53 = vld [vmem:[%s1356_s2 + $0x28] sm:$0xff]  }
  0x13   : > { %1045 = vmatpush3.bf16.msra.mxu1 %v1111_v4  ;;  %1034 = vmatprep.subr.bf16.mxu0 %v1153_v1  ;;  %v1252_v23 = vld [vmem:[%s289_s12] ss:$0 sps:$4 sm:$0x77]   ;;  %v421_v24 = vcombine.low %v303_v21, %v304_v9  ;;  %vm551_vm7 = vsmask.f32 7448  ;;  %vm1300_vm8 = vmor %vm1284_vm5, %vm549_vm6  ;;  %s1009_s13 = sshll.u32 %s1370_s15, 3 }
  0x14   : > { %1046 = vmatprep.subr.bf16.mxu1 %v1153_v1  ;;  %v326_v25 = vrot.slane %v319_v17, %v1250_v22  ;;  %v333_v26 = vrot.slane %v306_v11, %v1250_v22  ;;  %v436_v28 = vrot.slane %v422_v19, %v1250_v22  ;;  %v973_v36 = vld.sshfl [vmem:[%s1233_s8] sm:$0x13 pattern:$0x76325410]  ;;  %v726_v37 = vshrl.u32 %v1252_v23, 16  ;;  %vm1311_vm9 = vmor %vm1300_vm8, %vm551_vm7  ;;  %s300_s20 = scalar_lea.vmem %s1358_s4, %s1009_s13 }
  0x15   : > { %v429_v27 = vrot.slane %v421_v24, %v1250_v22  ;;  %v974_v38 = vld.sshfl [vmem:[%s1233_s8 + $0x4] sm:$0x13 pattern:$0x76325410]  ;;  %v521_v39 = vcombine.high %v973_v36, %v973_v36  ;;  %v554_v46 = vshrl.u32 %v973_v36, 16  ;;  %v557_v47 = vshll.u32 %v973_v36, 16 }
  0x16   : > { %1035 = vmatpush3.bf16.msra.mxu0 %v1112_v6  ;;  %v334_v30 = vcombine.low %v326_v25, %v333_v26  ;;  %v975_v40 = vld.sshfl [vmem:[%s1233_s8 + $0x8] sm:$0x13 pattern:$0x76325410]  ;;  %v529_v41 = vcombine.high %v974_v38, %v974_v38  ;;  %v568_v50 = vshrl.u32 %v974_v38, 16  ;;  %v571_v51 = vshll.u32 %v974_v38, 16 }
  0x17   : > { %1047 = vmatpush3.bf16.msra.mxu1 %v1113_v7  ;;  %1036 = vmatprep.subr.bf16.mxu0 %v1153_v1  ;;  %v437_v31 = vcombine.low %v429_v27, %v436_v28  ;;  %v976_v42 = vld.sshfl [vmem:[%s1233_s8 + $0xc] sm:$0x13 pattern:$0x76325410]  ;;  %v537_v43 = vcombine.high %v975_v40, %v975_v40  ;;  %v563_v49 = vshll.u32 %v521_v39, 16  ;;  %v556_v55 = vrot.slane %v554_v46, 6 }
  0x18   : > { %1048 = vmatprep.subr.bf16.mxu1 %v1153_v1  ;;  %v342_v33 = vsel %vm339_vm1, %v334_v30, %v338_v20  ;;  %v545_v45 = vcombine.high %v976_v42, %v976_v42  ;;  %v577_v52 = vshll.u32 %v529_v41, 16  ;;  %v559_v56 = vrot.slane %v557_v47, 7  ;;  %v1128_v4 = vld [vmem:[%s1356_s2 + $0x60] sm:$0xff]  }
  0x19   : > { %v582_v57 = vshrl.u32 %v975_v40, 16  ;;  %v585_v58 = vshll.u32 %v975_v40, 16  ;;  %v565_v59 = vrot.slane %v563_v49, 7  ;;  %v570_v60 = vrot.slane %v568_v50, 6  ;;  %v1127_v10 = vld [vmem:[%s1356_s2 + $0x20] sm:$0xff]  }
  0x1a   : > { %1037 = vmatpush3.bf16.msra.mxu0 %v1114_v14  ;;  %v573_v61 = vrot.slane %v571_v51, 7  ;;  %v579_v62 = vrot.slane %v577_v52, 7  ;;  %v560_v63 = vor.u32 %v559_v56, %v556_v55  ;;  %v591_v3 = vshll.u32 %v537_v43, 16  ;;  %v1004_v51 = vld [vmem:[%s1357_s3] ss:$0 sm:$0xff] }
  0x1b   : > { %1049 = vmatpush3.bf16.msra.mxu1 %v1115_v16  ;;  %1054 = vmatprep.subr.bf16.mxu0 %v1153_v1  ;;  %v584_v0 = vrot.slane %v582_v57, 6  ;;  %v587_v2 = vrot.slane %v585_v58, 7  ;;  %v596_v7 = vshrl.u32 %v976_v42, 16  ;;  %v599_v8 = vshll.u32 %v976_v42, 16 }
  0x1c   : > { %1066 = vmatprep.subr.bf16.mxu1 %v1153_v1  ;;  %v574_v6 = vor.u32 %v573_v61, %v570_v60  ;;  %v605_v9 = vshll.u32 %v545_v45, 16  ;;  %v561_v11 = vrot.slane %v560_v63, 2  ;;  %v593_v13 = vrot.slane %v591_v3, 7 }
  0x1d   : > { %1039 = vmatmul.mubr.msk.bf16.vlgmr.msra.gmra.mxu0 %vm376_vm2, %v342_v33  ;;  %v588_v12 = vor.u32 %v587_v2, %v584_v0  ;;  %v729_v14 = vshll.u32 %v1252_v23, 16  ;;  %v598_v16 = vrot.slane %v596_v7, 6  ;;  %v601_v17 = vrot.slane %v599_v8, 7 }
  0x1e   : > { %1051 = vmatmul.mubr.msk.bf16.vlgmr.msra.gmra.mxu1 %vm376_vm2, %v437_v31  ;;  %1055 = vmatpush3.bf16.msra.mxu0 %v1121_v32  ;;  %v575_v15 = vrot.slane %v574_v6, 2  ;;  %v566_v18 = vsel %vm1311_vm9, %v561_v11, %v565_v59  ;;  %v607_v24 = vrot.slane %v605_v9, 7  ;;  %vm835_vm10 = vcmask 254976  }
  0x1f   : > { %1067 = vmatpush3.bf16.msra.mxu1 %v1122_v29  ;;  %1056 = vmatprep.subr.bf16.mxu0 %v1153_v1  ;;  %v589_v19 = vrot.slane %v588_v12, 2  ;;  %v602_v21 = vor.u32 %v601_v17, %v598_v16  ;;  %v731_v27 = vrot.slane %v729_v14, 3 }
  0x20   : > { %1068 = vmatprep.subr.bf16.mxu1 %v1153_v1  ;;  %1062 = vmatprep.mubr.msk.bf16.mxu0 %vm1154_vm0, %v1153_v1  ;;  %v580_v20 = vsel %vm1311_vm9, %v575_v15, %v579_v62 }
  0x21   : > { %1074 = vmatprep.mubr.msk.bf16.mxu1 %vm1154_vm0, %v1153_v1  ;;  %v594_v25 = vsel %vm1311_vm9, %v589_v19, %v593_v13  ;;  %v618_v26 = vcombine.low %v566_v18, %v580_v20  ;;  %v603_v28 = vrot.slane %v602_v21, 2 }
  0x22   : > { %1057 = vmatpush3.bf16.msra.mxu0 %v1123_v34  ;;  %v706_v29 = vcombine.low %v580_v20, %v594_v25 }
  0x23   : > { %1069 = vmatpush3.bf16.msra.mxu1 %v1124_v35  ;;  %1058 = vmatprep.subr.bf16.mxu0 %v1153_v1  ;;  %v608_v30 = vsel %vm1311_vm9, %v603_v28, %v607_v24  ;;  %v626_v33 = vrot.slane %v618_v26, %v1250_v22 }
  0x24   : > { %1070 = vmatprep.subr.bf16.mxu1 %v1153_v1  ;;  %v713_v31 = vrot.slane %v706_v29, %v1250_v22  ;;  %v619_v32 = vcombine.low %v594_v25, %v608_v30  ;;  %v720_v34 = vrot.slane %v608_v30, %v1250_v22 }
  0x26   : > { %1059 = vmatpush3.bf16.msra.mxu0 %v1125_v53  ;;  %v633_v36 = vrot.slane %v619_v32, %v1250_v22  ;;  %v721_v38 = vcombine.low %v713_v31, %v720_v34 }
  0x27   : > { %1071 = vmatpush3.bf16.msra.mxu1 %v1126_v48  ;;  %1060 = vmatprep.subr.bf16.mxu0 %v1153_v1 }
  0x28   : > { %1072 = vmatprep.subr.bf16.mxu1 %v1153_v1  ;;  %v728_v1 = vrot.slane %v726_v37, 2  ;;  %v634_v39 = vcombine.low %v626_v33, %v633_v36 }
  0x2a   : > { %1061 = vmatpush3.bf16.msra.mxu0 %v1127_v10  ;;  %v732_v35 = vor.u32 %v731_v27, %v728_v1 }
  0x2b   : > { %1073 = vmatpush3.bf16.msra.mxu1 %v1128_v4 }
  0x2c   : > { %v735_v23 = vsel %vm339_vm1, %v721_v38, %v732_v35 }
  0x2d   : > { %1063 = vmatmul.mubr.msk.bf16.vlgmr.msra.gmra.mxu0 %vm376_vm2, %v634_v39 }
  0x2e   : > { %1075 = vmatmul.mubr.msk.bf16.vlgmr.msra.gmra.mxu1 %vm376_vm2, %v735_v23 }
  0xdd   : > { %v413_v40 = vpop.f32.mrf.mxu0 }
  0xde   : > { %v499_v37 = vpop.f32.mrf.mxu1 }
  0xdf   : > { %v1040_v42 = vpop.f32.mrf.mxu0  ;;  %v500_v47 = vadd.f32 %v499_v37, %v413_v40 }
  0xe0   : > { %v1052_v41 = vpop.f32.mrf.mxu1 }
  0xe1   : > { %v416_v44 = vpop.f32.mrf.mxu0 }
  0xe2   : > { %v502_v43 = vpop.f32.mrf.mxu1 }
  0xe3   : > { %v1041_v46 = vpop.f32.mrf.mxu0  ;;  %v503_v53 = vadd.f32 %v502_v43, %v416_v44 }
  0xe4   : > { %v1053_v45 = vpop.f32.mrf.mxu1 }
  0xed   : > { %v696_v22 = vpop.f32.mrf.mxu0 }
  0xee   : > { %v805_v48 = vpop.f32.mrf.mxu1  ;;  %v703_v49 = vadd.f32 %v696_v22, %v500_v47 }
  0xef   : > { %v1064_v52 = vpop.f32.mrf.mxu0 }
  0xf0   : > { %v1076_v50 = vpop.f32.mrf.mxu1  ;;  %v812_v54 = vadd.f32 %v805_v48, %v703_v49 }
  0xf1   : > { %v699_v56 = vpop.f32.mrf.mxu0 }
  0xf2   : > { %v808_v55 = vpop.f32.mrf.mxu1  ;;  %v821_v57 = vadd.f32 %v1004_v51, %v812_v54  ;;  %v704_v58 = vadd.f32 %v699_v56, %v503_v53 }
  0xf3   : > { %v1065_v60 = vpop.f32.mrf.mxu0 }
  0xf4   : > { %v1077_v59 = vpop.f32.mrf.mxu1  ;;  %v823_v61 = vmax.f32 %v821_v57, 0.0  ;;  %v813_v62 = vadd.f32 %v808_v55, %v704_v58 }
  0xf6   : > { %v827_v63 = vcombine.high %v823_v61, %v823_v61  ;;  %v831_v0 = vpack.c.bf16 %v823_v61, %v823_v61  ;;  %v822_v2 = vadd.f32 %v1004_v51, %v813_v62 }
  0xf8   : > { %v832_v3 = vpack.c.bf16 %v827_v63, %v827_v63  ;;  %836 = vst.msk [vmem:[%s300_s20] sm:$0x3] %vm835_vm10, %v831_v0  ;;  %v824_v4 = vmax.f32 %v822_v2, 0.0 }
  0xfa   : > { %837 = vst.msk [vmem:[%s300_s20 + $0x2] sm:$0x3] %vm835_vm10, %v832_v3  ;;  %v828_v5 = vcombine.high %v824_v4, %v824_v4  ;;  %v833_v6 = vpack.c.bf16 %v824_v4, %v824_v4 }
  0xfc   : > { %v834_v7 = vpack.c.bf16 %v828_v5, %v828_v5  ;;  %838 = vst.msk [vmem:[%s300_s20 + $0x4] sm:$0x3] %vm835_vm10, %v833_v6 }
  0xfe   : > { %839 = vst.msk [vmem:[%s300_s20 + $0x6] sm:$0x3] %vm835_vm10, %v834_v7 }
  0xff PF: > { %s14_s17 = sadd.s32 1, %s1151_s17   ;;  %s1365_s15 = smov %s1147_s16 }
 0x100   : > { %p11_p5 = scmp.ge.s32.totalorder %s14_s17, 4   ;;  %s1366_s16 = smov %s1368_s18 }
 0x102   :  { %13 = sbr.rel (!%p11_p5) target bundleno = 2 (0x2), region = 72 }

// kernel: torchvision_backbone_forward.8
= control target key start
LH: loop header
LB: loop body
LE: loop exit
PB: predicated region body
PF: predicated region fallthrough
CT: control target
= control target key end

     0   :  { %s1301_s15 = smov 0   ;;  %s1303_s16 = smov 0   ;;  %s1502_s0 = inlined_call_operand.vmem [shape: bf16[2,3,3,128], index: 0, kind: input, shape index: {}, may-alias: {0,1}]   ;;  %s1503_s1 = inlined_call_operand.vmem [shape: bf16[2,3,3,128], index: 1, kind: input, shape index: {}, may-alias: {0,1}]   ;;  %s1504_s2 = inlined_call_operand.vmem [shape: bf16[4,128,32], index: 2, kind: input, shape index: {}]   ;;  %s1505_s3 = inlined_call_operand.vmem [shape: f32[1,32], index: 3, kind: input, shape index: {}]   ;;  %s1506_s4 = inlined_call_operand.vmem [shape: bf16[2,2,2,32], index: 4, kind: output, shape index: {}]  }
   0x1   :  { %s1305_s17 = smov 0  }
   0x2 LB: > { %s26_s18 = sadd.s32 1, %s1266_s16  ;;  %p974_p0 = scmp.ge.s32.totalorder %s1270_s17, 1  ;;  %s1270_s17 = sphi %s1305_s17, %s14_s17   ;;  %s1266_s16 = sphi %s1303_s16, %s1508_s16   ;;  %s1262_s15 = sphi %s1301_s15, %s1507_s15  }
   0x3   : > { %p28_p1 = scmp.ge.s32.totalorder %s26_s18, 2  ;;  %p214_p2 = scmp.lt.s32.totalorder %s1270_s17, 3 }
   0x5   : > { %s1510_s18 = smov (%p28_p1, %s26_s18), 0  ;;  %p215_p3 = pnand %p974_p0, %p214_p2 }
   0x6   : > { %p266_p4 = scmp.lt.s32.totalorder (!%p215_p3), %s1262_s15, 1 }
   0x7   : > { %218 = sbr.rel (%p215_p3) target bundleno = 285 (0x11d), region = 36 }
   0xc   : > { %v1216_v0 = vld [vmem:[%s1504_s2 + $0xb8] sm:$0xff]   ;;  %v1272_v1 = vmov 0.0   ;;  %v1218_v3 = vld [vmem:[%s1504_s2 + $0xb0] sm:$0xff]   ;;  %vm1273_vm0 = vmmov 0   ;;  %s1512_s15 = smov (!%p266_p4, %s1262_s15), 1  ;;  %v1220_v5 = vld [vmem:[%s1504_s2 + $0xa8] sm:$0xff]   ;;  %v445_v10 = vlaneseq }
   0xd   : > { %1105 = vmatprep.subr.bf16.mxu0 %v1272_v1  ;;  %1125 = vmatprep.subr.bf16.mxu1 %v1272_v1  ;;  %v1217_v2 = vld [vmem:[%s1504_s2 + $0x38] sm:$0xff]   ;;  %v1219_v4 = vld [vmem:[%s1504_s2 + $0x30] sm:$0xff]   ;;  %v1221_v6 = vld [vmem:[%s1504_s2 + $0x28] sm:$0xff]   ;;  %s1185_s9 = smul.u32 6, %s1512_s15  ;;  %v1274_v12 = vmov 1966171168  }
   0xe   : > { %1106 = vmatpush3.bf16.msra.mxu0 %v1216_v0  ;;  %1121 = vmatprep.mubr.msk.bf16.mxu0 %vm1273_vm0, %v1272_v1  ;;  %v1222_v7 = vld [vmem:[%s1504_s2 + $0xa0] sm:$0xff]   ;;  %v1224_v9 = vld [vmem:[%s1504_s2 + $0x98] sm:$0xff]   ;;  %v443_v13 = vunpack.c.l.s4 %v1274_v12  ;;  %v1226_v14 = vld [vmem:[%s1504_s2 + $0x90] sm:$0xff]   ;;  %v1379_v15 = vshrl.u32 %v445_v10, 7  ;;  %vm329_vm1 = vcmask 1040384   ;;  %s977_s29 = sshll.u32 %s1512_s15, 1 }
   0xf   : > { %1126 = vmatpush3.bf16.msra.mxu1 %v1217_v2  ;;  %1107 = vmatprep.subr.bf16.mxu0 %v1272_v1  ;;  %v1223_v8 = vld [vmem:[%s1504_s2 + $0x20] sm:$0xff]   ;;  %v1225_v11 = vld [vmem:[%s1504_s2 + $0x18] sm:$0xff]   ;;  %s1068_s14 = sadd.s32 4, %s1185_s9  ;;  %s1369_s21 = scalar_lea.vmem %s1502_s0, %s1185_s9  ;;  %v1227_v16 = vld [vmem:[%s1504_s2 + $0x10] sm:$0xff]   ;;  %vm565_vm2 = vsmask.f32 256 }
  0x10   : > { %1127 = vmatprep.subr.bf16.mxu1 %v1272_v1  ;;  %1141 = vmatprep.mubr.msk.bf16.mxu1 %vm1273_vm0, %v1272_v1  ;;  %s1377_s26 = scalar_lea.vmem %s1503_s1, %s1068_s14  ;;  %v301_v17 = vld [vmem:[%s1369_s21] sm:$0x1]  ;;  %v302_v18 = vld [vmem:[%s1369_s21 + $0x2] sm:$0x1]  ;;  %v444_v19 = vunpack.c.0.s8 %v443_v13  ;;  %v1228_v20 = vld [vmem:[%s1504_s2 + $0x88] sm:$0xff]   ;;  %s298_s5 = scalar_lea.vmem %s1506_s4, %s977_s29 }
  0x11   : > { %v978_v21 = vld.sshfl [vmem:[%s1377_s26] sm:$0x1 pattern:$0x76325410]  ;;  %v1229_v22 = vld [vmem:[%s1504_s2 + $0x8] sm:$0xff]   ;;  %v441_v23 = vcombine.low %v301_v17, %v302_v18  ;;  %v1232_v31 = vld [vmem:[%s1504_s2 + $0x78] sm:$0xff]  }
  0x12   : > { %1108 = vmatpush3.bf16.msra.mxu0 %v1218_v3  ;;  %v1396_v24 = vsub.s32 %v444_v19, %v1379_v15  ;;  %v1230_v25 = vld [vmem:[%s1504_s2 + $0x80] sm:$0xff]   ;;  %v328_v26 = vrot.slane %v978_v21, 7  ;;  %v1233_v32 = vld [vmem:[%s1504_s2 + $0xf8] sm:$0xff]   ;;  %v1234_v33 = vld [vmem:[%s1504_s2 + $0x70] sm:$0xff]   ;;  %vm566_vm3 = vsmask.f32 1284 }
  0x13   : > { %1128 = vmatpush3.bf16.msra.mxu1 %v1219_v4  ;;  %1109 = vmatprep.subr.bf16.mxu0 %v1272_v1  ;;  %v1231_v28 = vld [vmem:[%s1504_s2] sm:$0xff]   ;;  %v1235_v34 = vld [vmem:[%s1504_s2 + $0xf0] sm:$0xff]   ;;  %vm568_vm4 = vsmask.f32 2312  ;;  %vm567_vm5 = vmor %vm565_vm2, %vm566_vm3  ;;  %vm570_vm6 = vsmask.f32 3340 }
  0x14   : > { %1129 = vmatprep.subr.bf16.mxu1 %v1272_v1  ;;  %v448_v27 = vrot.slane %v441_v23, %v1396_v24  ;;  %v332_v29 = vsel %vm329_vm1, %v302_v18, %v328_v26  ;;  %v1011_v35 = vld.sshfl [vmem:[%s1369_s21] sm:$0x11 pattern:$0x75316420]  ;;  %vm572_vm7 = vsmask.f32 4368  ;;  %vm569_vm8 = vmor %vm567_vm5, %vm568_vm4 }
  0x15   : > { %v1236_v36 = vld [vmem:[%s1504_s2 + $0x68] sm:$0xff]   ;;  %vm574_vm9 = vsmask.f32 5396  ;;  %vm571_vm10 = vmor %vm569_vm8, %vm570_vm6  ;;  %vm576_vm13 = vsmask.f32 6424  ;;  %v556_v39 = vcombine.high %v1011_v35, %v1011_v35  ;;  %v1238_v41 = vld [vmem:[%s1504_s2 + $0x60] sm:$0xff]  }
  0x16   : > { %1110 = vmatpush3.bf16.msra.mxu0 %v1220_v5  ;;  %v455_v30 = vrot.slane %v448_v27, %v1396_v24  ;;  %v1012_v37 = vld.sshfl [vmem:[%s1369_s21 + $0x2] sm:$0x11 pattern:$0x75316420]  ;;  %v1237_v38 = vld [vmem:[%s1504_s2 + $0xe8] sm:$0xff]   ;;  %vm573_vm11 = vmor %vm571_vm10, %vm572_vm7  ;;  %v581_v43 = vshrl.u32 %v1011_v35, 16 }
  0x17   : > { %1130 = vmatpush3.bf16.msra.mxu1 %v1221_v6  ;;  %1111 = vmatprep.subr.bf16.mxu0 %v1272_v1  ;;  %vm575_vm12 = vmor %vm573_vm11, %vm574_vm9  ;;  %v564_v40 = vcombine.high %v1012_v37, %v1012_v37  ;;  %v1239_v42 = vld [vmem:[%s1504_s2 + $0xe0] sm:$0xff]   ;;  %vm578_vm15 = vsmask.f32 7452  ;;  %v586_v44 = vshll.u32 %v556_v39, 16  ;;  %v590_v45 = vshrl.u32 %v1012_v37, 16  ;;  %v1240_v47 = vld [vmem:[%s1504_s2 + $0x58] sm:$0xff]  }
  0x18   : > { %1131 = vmatprep.subr.bf16.mxu1 %v1272_v1  ;;  %vm577_vm14 = vmor %vm575_vm12, %vm576_vm13  ;;  %v1241_v48 = vld [vmem:[%s1504_s2 + $0xd8] sm:$0xff]   ;;  %v1039_v49 = vld.sshfl [vmem:[%s1377_s26] sm:$0x3 pattern:$0x76325410] }
  0x19   : > { %v595_v46 = vshll.u32 %v564_v40, 16  ;;  %v1242_v50 = vld [vmem:[%s1504_s2 + $0x50] sm:$0xff]   ;;  %v730_v53 = vshrl.u32 %v1039_v49, 16  ;;  %v1244_v56 = vld [vmem:[%s1504_s2 + $0x48] sm:$0xff]   ;;  %v733_v57 = vshll.u32 %v1039_v49, 16  ;;  %v1246_v61 = vld [vmem:[%s1504_s2 + $0x40] sm:$0xff]  }
  0x1a   : > { %1112 = vmatpush3.bf16.msra.mxu0 %v1222_v7  ;;  %v1243_v54 = vld [vmem:[%s1504_s2 + $0xd0] sm:$0xff]   ;;  %v1245_v58 = vld [vmem:[%s1504_s2 + $0xc8] sm:$0xff]   ;;  %v1247_v62 = vld [vmem:[%s1504_s2 + $0xc0] sm:$0xff]  }
  0x1b   : > { %1132 = vmatpush3.bf16.msra.mxu1 %v1223_v8  ;;  %1113 = vmatprep.subr.bf16.mxu0 %v1272_v1  ;;  %v732_v59 = vrot.slane %v730_v53, 7  ;;  %v1064_v18 = vld [vmem:[%s1505_s3] ss:$0 sm:$0xff] }
  0x1c   : > { %1133 = vmatprep.subr.bf16.mxu1 %v1272_v1 }
  0x1d   : > { %v735_v63 = vor.u32 %v733_v57, %v732_v59 }
  0x1e   : > { %1114 = vmatpush3.bf16.msra.mxu0 %v1224_v9 }
  0x1f   : > { %1134 = vmatpush3.bf16.msra.mxu1 %v1225_v11  ;;  %1115 = vmatprep.subr.bf16.mxu0 %v1272_v1  ;;  %v1275_v11 = vmov 1983009808  }
  0x20   : > { %1135 = vmatprep.subr.bf16.mxu1 %v1272_v1  ;;  %v857_v12 = vunpack.c.l.s4 %v1275_v11 }
  0x22   : > { %1116 = vmatpush3.bf16.msra.mxu0 %v1226_v14  ;;  %v858_v17 = vunpack.c.0.s8 %v857_v12 }
  0x23   : > { %1136 = vmatpush3.bf16.msra.mxu1 %v1227_v16  ;;  %1117 = vmatprep.subr.bf16.mxu0 %v1272_v1 }
  0x24   : > { %1137 = vmatprep.subr.bf16.mxu1 %v1272_v1 }
  0x26   : > { %1118 = vmatpush3.bf16.msra.mxu0 %v1228_v20 }
  0x27   : > { %1138 = vmatpush3.bf16.msra.mxu1 %v1229_v22  ;;  %1119 = vmatprep.subr.bf16.mxu0 %v1272_v1 }
  0x28   : > { %1139 = vmatprep.subr.bf16.mxu1 %v1272_v1 }
  0x2a   : > { %1120 = vmatpush3.bf16.msra.mxu0 %v1230_v25 }
  0x2b   : > { %1140 = vmatpush3.bf16.msra.mxu1 %v1231_v28  ;;  %1145 = vmatprep.subr.bf16.mxu0 %v1272_v1 }
  0x2c   : > { %1165 = vmatprep.subr.bf16.mxu1 %v1272_v1 }
  0x2d   : > { %1122 = vmatmul.mubr.bf16.vlgmr.msra.gmra.mxu0 %v332_v29 }
  0x2e   : > { %1142 = vmatmul.mubr.bf16.vlgmr.msra.gmra.mxu1 %v455_v30  ;;  %1146 = vmatpush3.bf16.msra.mxu0 %v1232_v31 }
  0x2f   : > { %1166 = vmatpush3.bf16.msra.mxu1 %v1233_v32  ;;  %1147 = vmatprep.subr.bf16.mxu0 %v1272_v1 }
  0x30   : > { %1167 = vmatprep.subr.bf16.mxu1 %v1272_v1  ;;  %1161 = vmatprep.mubr.msk.bf16.mxu0 %vm1273_vm0, %v1272_v1 }
  0x31   : > { %1181 = vmatprep.mubr.msk.bf16.mxu1 %vm1273_vm0, %v1272_v1  ;;  %vm579_vm0 = vmor %vm577_vm14, %vm578_vm15 }
  0x32   : > { %1148 = vmatpush3.bf16.msra.mxu0 %v1234_v33  ;;  %v588_v51 = vsel %vm579_vm0, %v581_v43, %v586_v44  ;;  %v597_v52 = vsel %vm579_vm0, %v590_v45, %v595_v46 }
  0x33   : > { %1168 = vmatpush3.bf16.msra.mxu1 %v1235_v34  ;;  %1149 = vmatprep.subr.bf16.mxu0 %v1272_v1  ;;  %v615_v55 = vcombine.low %v588_v51, %v597_v52  ;;  %v738_v2 = vsel %vm329_vm1, %v597_v52, %v735_v63  ;;  %vm868_vm1 = vcmask 253952  }
  0x34   : > { %1169 = vmatprep.subr.bf16.mxu1 %v1272_v1 }
  0x35   : > { %v622_v60 = vrot.slane %v615_v55, %v1396_v24 }
  0x36   : > { %1150 = vmatpush3.bf16.msra.mxu0 %v1236_v36 }
  0x37   : > { %1170 = vmatpush3.bf16.msra.mxu1 %v1237_v38  ;;  %1151 = vmatprep.subr.bf16.mxu0 %v1272_v1  ;;  %v629_v0 = vrot.slane %v622_v60, %v1396_v24  ;;  %v861_v24 = vsub.s32 %v858_v17, %v1379_v15 }
  0x38   : > { %1171 = vmatprep.subr.bf16.mxu1 %v1272_v1 }
  0x3a   : > { %1152 = vmatpush3.bf16.msra.mxu0 %v1238_v41 }
  0x3b   : > { %1172 = vmatpush3.bf16.msra.mxu1 %v1239_v42  ;;  %1153 = vmatprep.subr.bf16.mxu0 %v1272_v1 }
  0x3c   : > { %1173 = vmatprep.subr.bf16.mxu1 %v1272_v1 }
  0x3e   : > { %1154 = vmatpush3.bf16.msra.mxu0 %v1240_v47 }
  0x3f   : > { %1174 = vmatpush3.bf16.msra.mxu1 %v1241_v48  ;;  %1155 = vmatprep.subr.bf16.mxu0 %v1272_v1 }
  0x40   : > { %1175 = vmatprep.subr.bf16.mxu1 %v1272_v1 }
  0x42   : > { %1156 = vmatpush3.bf16.msra.mxu0 %v1242_v50 }
  0x43   : > { %1176 = vmatpush3.bf16.msra.mxu1 %v1243_v54  ;;  %1157 = vmatprep.subr.bf16.mxu0 %v1272_v1 }
  0x44   : > { %1177 = vmatprep.subr.bf16.mxu1 %v1272_v1 }
  0x46   : > { %1158 = vmatpush3.bf16.msra.mxu0 %v1244_v56 }
  0x47   : > { %1178 = vmatpush3.bf16.msra.mxu1 %v1245_v58  ;;  %1159 = vmatprep.subr.bf16.mxu0 %v1272_v1 }
  0x48   : > { %1179 = vmatprep.subr.bf16.mxu1 %v1272_v1 }
  0x4a   : > { %1160 = vmatpush3.bf16.msra.mxu0 %v1246_v61 }
  0x4b   : > { %1180 = vmatpush3.bf16.msra.mxu1 %v1247_v62 }
  0x4d   : > { %1162 = vmatmul.mubr.bf16.vlgmr.msra.gmra.mxu0 %v629_v0 }
  0x4e   : > { %1182 = vmatmul.mubr.bf16.vlgmr.msra.gmra.mxu1 %v738_v2 }
  0xed   : > { %v433_v3 = vpop.f32.mrf.mxu0 }
  0xee   : > { %v539_v4 = vpop.f32.mrf.mxu1 }
  0xef   : > { %v1123_v5 = vpop.f32.mrf.mxu0  ;;  %v540_v1 = vadd.f32 %v539_v4, %v433_v3 }
  0xf0   : > { %v1143_v6 = vpop.f32.mrf.mxu1 }
  0xf1   : > { %v436_v7 = vpop.f32.mrf.mxu0 }
  0xf2   : > { %v542_v8 = vpop.f32.mrf.mxu1 }
  0xf3   : > { %v1124_v9 = vpop.f32.mrf.mxu0 }
  0xf4   : > { %v1144_v10 = vpop.f32.mrf.mxu1 }
 0x10d   : > { %v713_v13 = vpop.f32.mrf.mxu0 }
 0x10e   : > { %v719_v14 = vadd.f32 %v713_v13, %v540_v1  ;;  %v839_v16 = vpop.f32.mrf.mxu1 }
 0x10f   : > { %v1163_v19 = vpop.f32.mrf.mxu0 }
 0x110   : > { %v845_v20 = vadd.f32 %v839_v16, %v719_v14  ;;  %v1183_v21 = vpop.f32.mrf.mxu1 }
 0x111   : > { %v716_v22 = vpop.f32.mrf.mxu0 }
 0x112   : > { %v853_v23 = vadd.f32 %v1064_v18, %v845_v20  ;;  %v842_v25 = vpop.f32.mrf.mxu1 }
 0x113   : > { %v1164_v26 = vpop.f32.mrf.mxu0 }
 0x114   : > { %v854_v27 = vmax.f32 %v853_v23, 0.0  ;;  %v1184_v28 = vpop.f32.mrf.mxu1 }
 0x116   : > { %v862_v29 = vrot.slane %v854_v27, %v861_v24 }
 0x118   : > { %v863_v30 = vcombine.high %v862_v29, %v862_v29  ;;  %v866_v31 = vpack.c.bf16 %v862_v29, %v862_v29 }
 0x11a   : > { %v867_v32 = vpack.c.bf16 %v863_v30, %v863_v30  ;;  %869 = vst.msk [vmem:[%s298_s5] sm:$0x1] %vm868_vm1, %v866_v31 }
 0x11c   : > { %870 = vst.msk [vmem:[%s298_s5 + $0x1] sm:$0x1] %vm868_vm1, %v867_v32 }
 0x11d PF: > { %s14_s17 = sadd.s32 1, %s1270_s17   ;;  %s1507_s15 = smov %s1266_s16 }
 0x11e   : > { %p11_p5 = scmp.ge.s32.totalorder %s14_s17, 4   ;;  %s1508_s16 = smov %s1510_s18 }
 0x120   :  { %13 = sbr.rel (!%p11_p5) target bundleno = 2 (0x2), region = 72 }

// kernel: torchvision_backbone_forward.9
= control target key start
LH: loop header
LB: loop body
LE: loop exit
PB: predicated region body
PF: predicated region fallthrough
CT: control target
= control target key end

     0   :  { %s1130_s15 = smov 0   ;;  %s1132_s16 = smov 0   ;;  %s1317_s0 = inlined_call_operand.vmem [shape: bf16[2,2,2,128], index: 0, kind: input, shape index: {}, may-alias: {0,1}]   ;;  %s1318_s1 = inlined_call_operand.vmem [shape: bf16[2,2,2,128], index: 1, kind: input, shape index: {}, may-alias: {0,1}]   ;;  %s1319_s2 = inlined_call_operand.vmem [shape: bf16[4,128,32], index: 2, kind: input, shape index: {}]   ;;  %s1320_s3 = inlined_call_operand.vmem [shape: f32[1,32], index: 3, kind: input, shape index: {}]   ;;  %s1321_s4 = inlined_call_operand.vmem [shape: bf16[2,1,1,32], index: 4, kind: output, shape index: {}]  }
   0x1   :  { %s1134_s17 = smov 0  }
   0x2 LB: > { %s26_s18 = sadd.s32 1, %s1096_s16  ;;  %p817_p0 = scmp.ge.s32.totalorder %s1100_s17, 1  ;;  %s1100_s17 = sphi %s1134_s17, %s14_s17   ;;  %s1096_s16 = sphi %s1132_s16, %s1323_s16   ;;  %s1092_s15 = sphi %s1130_s15, %s1322_s15  }
   0x3   : > { %p28_p1 = scmp.ge.s32.totalorder %s26_s18, 2  ;;  %p198_p2 = scmp.lt.s32.totalorder %s1100_s17, 3 }
   0x5   : > { %s1325_s18 = smov (%p28_p1, %s26_s18), 0  ;;  %p199_p3 = pnand %p817_p0, %p198_p2 }
   0x6   : > { %p235_p4 = scmp.lt.s32.totalorder (!%p199_p3), %s1092_s15, 1 }
   0x7   : > { %202 = sbr.rel (%p199_p3) target bundleno = 282 (0x11a), region = 36 }
   0xc   : > { %v1046_v0 = vld [vmem:[%s1319_s2 + $0xb8] sm:$0xff]   ;;  %v1102_v1 = vmov 0.0   ;;  %v1048_v3 = vld [vmem:[%s1319_s2 + $0xb0] sm:$0xff]   ;;  %vm1103_vm0 = vmmov 0   ;;  %v1050_v5 = vld [vmem:[%s1319_s2 + $0xa8] sm:$0xff]   ;;  %s1327_s15 = smov (!%p235_p4, %s1092_s15), 1  ;;  %v490_v27 = vlaneseq }
   0xd   : > { %939 = vmatprep.subr.bf16.mxu0 %v1102_v1  ;;  %959 = vmatprep.subr.bf16.mxu1 %v1102_v1  ;;  %v1047_v2 = vld [vmem:[%s1319_s2 + $0x38] sm:$0xff]   ;;  %v1049_v4 = vld [vmem:[%s1319_s2 + $0x30] sm:$0xff]   ;;  %v1051_v6 = vld [vmem:[%s1319_s2 + $0x28] sm:$0xff]   ;;  %s818_s21 = sshll.u32 %s1327_s15, 1  ;;  %v1104_v25 = vmov 1966171168   ;;  %s256_s30 = scalar_lea.vmem %s1321_s4, %s1327_s15 }
   0xe   : > { %940 = vmatpush3.bf16.msra.mxu0 %v1046_v0  ;;  %955 = vmatprep.mubr.msk.bf16.mxu0 %vm1103_vm0, %v1102_v1  ;;  %v1052_v7 = vld [vmem:[%s1319_s2 + $0xa0] sm:$0xff]   ;;  %v1054_v9 = vld [vmem:[%s1319_s2 + $0x98] sm:$0xff]   ;;  %v1056_v11 = vld [vmem:[%s1319_s2 + $0x90] sm:$0xff]   ;;  %s248_s24 = sadd.s32 1, %s818_s21  ;;  %s241_s8 = scalar_lea.vmem %s1317_s0, %s818_s21  ;;  %v488_v26 = vunpack.c.l.s4 %v1104_v25  ;;  %v491_v31 = vshrl.u32 %v490_v27, 7  ;;  %vm724_vm1 = vcmask 253952  }
   0xf   : > { %960 = vmatpush3.bf16.msra.mxu1 %v1047_v2  ;;  %941 = vmatprep.subr.bf16.mxu0 %v1102_v1  ;;  %v1053_v8 = vld [vmem:[%s1319_s2 + $0x20] sm:$0xff]   ;;  %v1055_v10 = vld [vmem:[%s1319_s2 + $0x18] sm:$0xff]   ;;  %v1057_v12 = vld [vmem:[%s1319_s2 + $0x10] sm:$0xff]   ;;  %s1218_s29 = scalar_lea.vmem %s1318_s1, %s248_s24  ;;  %vm725_vm2 = vsmask.f32 256 }
  0x10   : > { %961 = vmatprep.subr.bf16.mxu1 %v1102_v1  ;;  %975 = vmatprep.mubr.msk.bf16.mxu1 %vm1103_vm0, %v1102_v1  ;;  %v1058_v13 = vld [vmem:[%s1319_s2 + $0x88] sm:$0xff]   ;;  %v1060_v15 = vld [vmem:[%s1319_s2 + $0x80] sm:$0xff]   ;;  %v1062_v19 = vld [vmem:[%s1319_s2 + $0x78] sm:$0xff]   ;;  %v489_v30 = vunpack.c.0.s8 %v488_v26 }
  0x11   : > { %v1059_v14 = vld [vmem:[%s1319_s2 + $0x8] sm:$0xff]   ;;  %v1061_v16 = vld [vmem:[%s1319_s2] sm:$0xff]   ;;  %v1063_v20 = vld [vmem:[%s1319_s2 + $0xf8] sm:$0xff]  }
  0x12   : > { %942 = vmatpush3.bf16.msra.mxu0 %v1048_v3  ;;  %v275_v17 = vld [vmem:[%s1218_s29] sm:$0x1]  ;;  %v1064_v21 = vld [vmem:[%s1319_s2 + $0x70] sm:$0xff]   ;;  %v1066_v23 = vld [vmem:[%s1319_s2 + $0x68] sm:$0xff]   ;;  %v492_v34 = vsub.s32 %v489_v30, %v491_v31 }
  0x13   : > { %962 = vmatpush3.bf16.msra.mxu1 %v1049_v4  ;;  %943 = vmatprep.subr.bf16.mxu0 %v1102_v1  ;;  %v258_v18 = vld [vmem:[%s241_s8] sm:$0x1]  ;;  %v1065_v22 = vld [vmem:[%s1319_s2 + $0xf0] sm:$0xff]   ;;  %v1067_v24 = vld [vmem:[%s1319_s2 + $0xe8] sm:$0xff]  }
  0x14   : > { %963 = vmatprep.subr.bf16.mxu1 %v1102_v1  ;;  %v1068_v28 = vld [vmem:[%s1319_s2 + $0x60] sm:$0xff]   ;;  %v1070_v32 = vld [vmem:[%s1319_s2 + $0x58] sm:$0xff]   ;;  %v1072_v35 = vld [vmem:[%s1319_s2 + $0x50] sm:$0xff]   ;;  %v493_v37 = vrot.slane %v258_v18, %v492_v34 }
  0x15   : > { %v1069_v29 = vld [vmem:[%s1319_s2 + $0xe0] sm:$0xff]   ;;  %v1071_v33 = vld [vmem:[%s1319_s2 + $0xd8] sm:$0xff]   ;;  %v1073_v36 = vld [vmem:[%s1319_s2 + $0xd0] sm:$0xff]  }
  0x16   : > { %944 = vmatpush3.bf16.msra.mxu0 %v1050_v5  ;;  %v1074_v38 = vld [vmem:[%s1319_s2 + $0x48] sm:$0xff]   ;;  %v892_v39 = vld.sshfl [vmem:[%s1218_s29] sm:$0x1 pattern:$0x75316420]  ;;  %v500_v41 = vrot.slane %v493_v37, %v492_v34  ;;  %vm726_vm3 = vmand %vm724_vm1, %vm725_vm2 }
  0x17   : > { %964 = vmatpush3.bf16.msra.mxu1 %v1051_v6  ;;  %945 = vmatprep.subr.bf16.mxu0 %v1102_v1  ;;  %v1075_v40 = vld [vmem:[%s1319_s2 + $0xc8] sm:$0xff]   ;;  %v626_v42 = vrot.slane %v892_v39, %v492_v34  ;;  %v1076_v43 = vld [vmem:[%s1319_s2 + $0x40] sm:$0xff]  }
  0x18   : > { %965 = vmatprep.subr.bf16.mxu1 %v1102_v1  ;;  %v1077_v44 = vld [vmem:[%s1319_s2 + $0xc0] sm:$0xff]   ;;  %v502_v45 = vshrl.u32 %v500_v41, 16 }
  0x19   : > { %v628_v46 = vshrl.u32 %v626_v42, 16  ;;  %v720_v59 = vld [vmem:[%s1320_s3] sm:$0x1] }
  0x1a   : > { %946 = vmatpush3.bf16.msra.mxu0 %v1052_v7  ;;  %v727_v5 = vld [vmem:[%s256_s30] sm:$0x1] }
  0x1b   : > { %966 = vmatpush3.bf16.msra.mxu1 %v1053_v8  ;;  %947 = vmatprep.subr.bf16.mxu0 %v1102_v1 }
  0x1c   : > { %967 = vmatprep.subr.bf16.mxu1 %v1102_v1 }
  0x1e   : > { %948 = vmatpush3.bf16.msra.mxu0 %v1054_v9 }
  0x1f   : > { %968 = vmatpush3.bf16.msra.mxu1 %v1055_v10  ;;  %949 = vmatprep.subr.bf16.mxu0 %v1102_v1 }
  0x20   : > { %969 = vmatprep.subr.bf16.mxu1 %v1102_v1 }
  0x22   : > { %950 = vmatpush3.bf16.msra.mxu0 %v1056_v11 }
  0x23   : > { %970 = vmatpush3.bf16.msra.mxu1 %v1057_v12  ;;  %951 = vmatprep.subr.bf16.mxu0 %v1102_v1 }
  0x24   : > { %971 = vmatprep.subr.bf16.mxu1 %v1102_v1 }
  0x26   : > { %952 = vmatpush3.bf16.msra.mxu0 %v1058_v13 }
  0x27   : > { %972 = vmatpush3.bf16.msra.mxu1 %v1059_v14  ;;  %953 = vmatprep.subr.bf16.mxu0 %v1102_v1 }
  0x28   : > { %973 = vmatprep.subr.bf16.mxu1 %v1102_v1 }
  0x2a   : > { %954 = vmatpush3.bf16.msra.mxu0 %v1060_v15 }
  0x2b   : > { %974 = vmatpush3.bf16.msra.mxu1 %v1061_v16  ;;  %979 = vmatprep.subr.bf16.mxu0 %v1102_v1 }
  0x2c   : > { %999 = vmatprep.subr.bf16.mxu1 %v1102_v1 }
  0x2d   : > { %956 = vmatmul.mubr.bf16.vlgmr.msra.gmra.mxu0 %v275_v17 }
  0x2e   : > { %976 = vmatmul.mubr.bf16.vlgmr.msra.gmra.mxu1 %v258_v18  ;;  %980 = vmatpush3.bf16.msra.mxu0 %v1062_v19 }
  0x2f   : > { %1000 = vmatpush3.bf16.msra.mxu1 %v1063_v20  ;;  %981 = vmatprep.subr.bf16.mxu0 %v1102_v1 }
  0x30   : > { %1001 = vmatprep.subr.bf16.mxu1 %v1102_v1  ;;  %995 = vmatprep.mubr.msk.bf16.mxu0 %vm1103_vm0, %v1102_v1 }
  0x31   : > { %1015 = vmatprep.mubr.msk.bf16.mxu1 %vm1103_vm0, %v1102_v1 }
  0x32   : > { %982 = vmatpush3.bf16.msra.mxu0 %v1064_v21 }
  0x33   : > { %1002 = vmatpush3.bf16.msra.mxu1 %v1065_v22  ;;  %983 = vmatprep.subr.bf16.mxu0 %v1102_v1 }
  0x34   : > { %1003 = vmatprep.subr.bf16.mxu1 %v1102_v1 }
  0x36   : > { %984 = vmatpush3.bf16.msra.mxu0 %v1066_v23 }
  0x37   : > { %1004 = vmatpush3.bf16.msra.mxu1 %v1067_v24  ;;  %985 = vmatprep.subr.bf16.mxu0 %v1102_v1 }
  0x38   : > { %1005 = vmatprep.subr.bf16.mxu1 %v1102_v1 }
  0x3a   : > { %986 = vmatpush3.bf16.msra.mxu0 %v1068_v28 }
  0x3b   : > { %1006 = vmatpush3.bf16.msra.mxu1 %v1069_v29  ;;  %987 = vmatprep.subr.bf16.mxu0 %v1102_v1 }
  0x3c   : > { %1007 = vmatprep.subr.bf16.mxu1 %v1102_v1 }
  0x3e   : > { %988 = vmatpush3.bf16.msra.mxu0 %v1070_v32 }
  0x3f   : > { %1008 = vmatpush3.bf16.msra.mxu1 %v1071_v33  ;;  %989 = vmatprep.subr.bf16.mxu0 %v1102_v1 }
  0x40   : > { %1009 = vmatprep.subr.bf16.mxu1 %v1102_v1 }
  0x42   : > { %990 = vmatpush3.bf16.msra.mxu0 %v1072_v35 }
  0x43   : > { %1010 = vmatpush3.bf16.msra.mxu1 %v1073_v36  ;;  %991 = vmatprep.subr.bf16.mxu0 %v1102_v1 }
  0x44   : > { %1011 = vmatprep.subr.bf16.mxu1 %v1102_v1 }
  0x46   : > { %992 = vmatpush3.bf16.msra.mxu0 %v1074_v38 }
  0x47   : > { %1012 = vmatpush3.bf16.msra.mxu1 %v1075_v40  ;;  %993 = vmatprep.subr.bf16.mxu0 %v1102_v1 }
  0x48   : > { %1013 = vmatprep.subr.bf16.mxu1 %v1102_v1 }
  0x4a   : > { %994 = vmatpush3.bf16.msra.mxu0 %v1076_v43 }
  0x4b   : > { %1014 = vmatpush3.bf16.msra.mxu1 %v1077_v44 }
  0x4d   : > { %996 = vmatmul.mubr.bf16.vlgmr.msra.gmra.mxu0 %v502_v45 }
  0x4e   : > { %1016 = vmatmul.mubr.bf16.vlgmr.msra.gmra.mxu1 %v628_v46 }
  0xed   : > { %v375_v47 = vpop.f32.mrf.mxu0 }
  0xee   : > { %v463_v48 = vpop.f32.mrf.mxu1 }
  0xef   : > { %v957_v49 = vpop.f32.mrf.mxu0  ;;  %v464_v55 = vadd.f32 %v463_v48, %v375_v47 }
  0xf0   : > { %v977_v50 = vpop.f32.mrf.mxu1 }
  0xf1   : > { %v378_v51 = vpop.f32.mrf.mxu0 }
  0xf2   : > { %v466_v52 = vpop.f32.mrf.mxu1 }
  0xf3   : > { %v958_v53 = vpop.f32.mrf.mxu0 }
  0xf4   : > { %v978_v54 = vpop.f32.mrf.mxu1 }
 0x10d   : > { %v587_v56 = vpop.f32.mrf.mxu0 }
 0x10e   : > { %v593_v57 = vadd.f32 %v587_v56, %v464_v55  ;;  %v713_v58 = vpop.f32.mrf.mxu1 }
 0x10f   : > { %v997_v60 = vpop.f32.mrf.mxu0 }
 0x110   : > { %v719_v61 = vadd.f32 %v713_v58, %v593_v57  ;;  %v1017_v62 = vpop.f32.mrf.mxu1 }
 0x111   : > { %v590_v63 = vpop.f32.mrf.mxu0 }
 0x112   : > { %v721_v0 = vadd.f32 %v720_v59, %v719_v61  ;;  %v716_v1 = vpop.f32.mrf.mxu1 }
 0x113   : > { %v998_v2 = vpop.f32.mrf.mxu0 }
 0x114   : > { %v722_v3 = vmax.f32 %v721_v0, 0.0  ;;  %v1018_v4 = vpop.f32.mrf.mxu1 }
 0x116   : > { %v723_v6 = vpack.c.bf16 %v722_v3, %v722_v3 }
 0x118   : > { %v728_v7 = vsel %vm726_vm3, %v723_v6, %v727_v5 }
 0x119   : > { %729 = vst [vmem:[%s256_s30] sm:$0x1] %v728_v7 }
 0x11a PF: > { %s14_s17 = sadd.s32 1, %s1100_s17   ;;  %s1322_s15 = smov %s1096_s16 }
 0x11b   : > { %p11_p5 = scmp.ge.s32.totalorder %s14_s17, 4   ;;  %s1323_s16 = smov %s1325_s18 }
 0x11d   :  { %13 = sbr.rel (!%p11_p5) target bundleno = 2 (0x2), region = 72 }

</bundles_post_ra>
